<compile_context>
chip_gen: v7x
topology: tpu7x:2x2x1
jax: 0.10.0
libtpu: 0.0.40
codegen_flags: <defaults>
</compile_context>

<pallas_src>
import jax
import jax.numpy as jnp
from jax.experimental import pallas as pl
from jax.experimental.pallas import tpu as pltpu

# ---- "config" constants -----------------------------------------------------
DIM_IN = 96                      # spo_feat channel dim (must be divisible by 3)
DIM_HALF = DIM_IN // 2           # 48
DIM_FINAL = DIM_IN // 3          # 32
SPT_IN = 28                      # hardcoded in the module
SPT_HID = 64
MIX_HID = 1024
NUM_PRD_CLASSES = 8 + 1          # NUM_PRD_CLASSES + 1 (USE_BG)
CLS_PAD = 128                    # lane-dense padded class dim for score/softmax/store

LEAKY_SLOPE = 0.1                # nn.LeakyReLU(0.1) in the reference module
NEG_INF_BIAS = -1e30             # bias for padded class columns (exp underflows to 0)


def _leaky_relu(x):
    return jnp.where(x > 0, x, LEAKY_SLOPE * x)


def _round_up(x, m):
    return ((x + m - 1) // m) * m


def reldn_head_kernel(spo_ref, spt_ref,
                      w1_ref, b1_ref, w2_ref, b2_ref,
                      w3_ref, b3_ref, w4_ref, b4_ref,
                      w5a_ref, w5b_ref, b5_ref,
                      w6_ref, b6_ref,
                      ttl_ref):
    """Fused MLP chain + softmax for one tile of rows (bf16 MXU, f32 VPU)."""
    f32 = jnp.float32
    bf16 = jnp.bfloat16

    # prd_cls_feats branch: Linear -> LeakyReLU -> Linear -> LeakyReLU
    h1 = _leaky_relu(
        jnp.dot(spo_ref[...], w1_ref[...], preferred_element_type=f32) + b1_ref[...])
    prd = _leaky_relu(
        jnp.dot(h1.astype(bf16), w2_ref[...], preferred_element_type=f32) + b2_ref[...])

    # spt_cls_feats branch: Linear -> LeakyReLU -> Linear -> LeakyReLU
    s1 = _leaky_relu(
        jnp.dot(spt_ref[...], w3_ref[...], preferred_element_type=f32) + b3_ref[...])
    s2 = _leaky_relu(
        jnp.dot(s1.astype(bf16), w4_ref[...], preferred_element_type=f32) + b4_ref[...])

    # mix_feats on cat((prd, s2), dim=1): split the weight instead of concatenating.
    mix = _leaky_relu(
        jnp.dot(prd.astype(bf16), w5a_ref[...], preferred_element_type=f32)
        + jnp.dot(s2.astype(bf16), w5b_ref[...], preferred_element_type=f32)
        + b5_ref[...])

    # mix_scores (Linear, class dim padded to 128 lanes)
    # -> ttl_cls_scores = softmax (eval mode, ADD_SCORES_ALL).
    score = jnp.dot(mix.astype(bf16), w6_ref[...], preferred_element_type=f32) + b6_ref[...]
    m = jnp.max(score, axis=-1, keepdims=True)
    e = jnp.exp(score - m)                       # padded cols: exp(-1e30) == 0 exactly
    denom = jnp.sum(e, axis=-1, keepdims=True)
    # Exact division (full-precision reciprocal); approximate vrcp was not
    # accurate enough for row-sums to hit 1 within 1e-3.
    ttl_ref[...] = (e / denom).astype(ttl_ref.dtype)


def _xavier(key, fan_in, fan_out):
    # Deterministic Xavier/Glorot-uniform fill (Detectron XavierFill analogue).
    limit = jnp.sqrt(3.0 / fan_in)
    return jax.random.uniform(key, (fan_in, fan_out), jnp.float32, -limit, limit)


def init_params(key):
    ks = jax.random.split(key, 6)
    return {
        "w1": _xavier(ks[0], DIM_IN, DIM_HALF),    "b1": jnp.zeros((1, DIM_HALF), jnp.float32),
        "w2": _xavier(ks[1], DIM_HALF, DIM_FINAL), "b2": jnp.zeros((1, DIM_FINAL), jnp.float32),
        "w3": _xavier(ks[2], SPT_IN, SPT_HID),     "b3": jnp.zeros((1, SPT_HID), jnp.float32),
        "w4": _xavier(ks[3], SPT_HID, SPT_HID),    "b4": jnp.zeros((1, SPT_HID), jnp.float32),
        "w5": _xavier(ks[4], DIM_FINAL + SPT_HID, MIX_HID),
        "b5": jnp.zeros((1, MIX_HID), jnp.float32),
        "w6": _xavier(ks[5], MIX_HID, NUM_PRD_CLASSES),
        "b6": jnp.zeros((1, NUM_PRD_CLASSES), jnp.float32),
    }


def reldn_head_forward(spo_feat, spt_feat, params, *, tile_n=256):
    """Returns (prd_vis_scores, prd_bias_scores, prd_spt_scores,
                ttl_cls_scores, sbj_cls_scores, obj_cls_scores)."""
    # Squeeze trailing 1x1 spatial dims, same as the PyTorch module.
    if spo_feat.ndim == 4:
        spo_feat = spo_feat.reshape(spo_feat.shape[0], spo_feat.shape[1])
    n = spo_feat.shape[0]

    # Effective row tile: small batches collapse to a single grid step;
    # otherwise use tile_n (default 256, a 128-multiple, ~3 MiB/step VMEM
    # including double-buffers). 16-multiple for bf16 sublane packing.
    if n <= tile_n:
        tile_eff = max(16, _round_up(n, 16))
    else:
        tile_eff = tile_n
    n_pad = _round_up(n, tile_eff)

    bf16 = jnp.bfloat16
    f32 = jnp.float32

    # Pad rows (never assert) and cast activations to bf16 for the MXU.
    spo = jnp.zeros((n_pad, DIM_IN), bf16).at[:n].set(spo_feat.astype(bf16))
    spt = jnp.zeros((n_pad, SPT_IN), bf16).at[:n].set(spt_feat.astype(bf16))

    # bf16 weights; biases stay f32 (added post-accumulation on the VPU).
    w1 = params["w1"].astype(bf16)
    w2 = params["w2"].astype(bf16)
    w3 = params["w3"].astype(bf16)
    w4 = params["w4"].astype(bf16)
    # Split mix_feats weight along its input dim to avoid an in-kernel concat.
    w5a = params["w5"][:DIM_FINAL].astype(bf16)
    w5b = params["w5"][DIM_FINAL:].astype(bf16)
    # Pad the score layer's class dim to 128 lanes; padded columns get a huge
    # negative bias so the in-kernel softmax zeroes them exactly.
    w6 = jnp.zeros((MIX_HID, CLS_PAD), bf16).at[:, :NUM_PRD_CLASSES].set(
        params["w6"].astype(bf16))
    b6 = jnp.full((1, CLS_PAD), NEG_INF_BIAS, f32).at[:, :NUM_PRD_CLASSES].set(
        params["b6"])

    full = lambda shape: pl.BlockSpec(shape, lambda i: (0, 0))
    row = lambda c: pl.BlockSpec((tile_eff, c), lambda i: (i, 0))

    ttl_pad = pl.pallas_call(
        reldn_head_kernel,
        out_shape=jax.ShapeDtypeStruct((n_pad, CLS_PAD), f32),
        grid_spec=pltpu.PrefetchScalarGridSpec(
            num_scalar_prefetch=0,
            grid=(n_pad // tile_eff,),
            in_specs=[
                row(DIM_IN), row(SPT_IN),
                full((DIM_IN, DIM_HALF)), full((1, DIM_HALF)),
                full((DIM_HALF, DIM_FINAL)), full((1, DIM_FINAL)),
                full((SPT_IN, SPT_HID)), full((1, SPT_HID)),
                full((SPT_HID, SPT_HID)), full((1, SPT_HID)),
                full((DIM_FINAL, MIX_HID)), full((SPT_HID, MIX_HID)), full((1, MIX_HID)),
                full((MIX_HID, CLS_PAD)), full((1, CLS_PAD)),
            ],
            out_specs=row(CLS_PAD),
        ),
        # Row tiles are fully independent -> megacore sharding on v7x,
        # no-op on single-TC v5e/v6e.
        compiler_params=pltpu.CompilerParams(dimension_semantics=("parallel",)),
    )(spo, spt,
      w1, params["b1"], w2, params["b2"],
      w3, params["b3"], w4, params["b4"],
      w5a, w5b, params["b5"], w6, b6)

    # Drop row padding and the padded class columns.
    ttl = ttl_pad[:n, :NUM_PRD_CLASSES]

    # prd_vis_scores, prd_bias_scores, prd_spt_scores, sbj/obj scores are None
    # on this config path, exactly as in the PyTorch forward.
    return (None, None, None, ttl, None, None)


def _reference_forward(spo_feat, spt_feat, params):
    """Pure-JAX reference mirroring the kernel's bf16-matmul / f32-accumulate math."""
    if spo_feat.ndim == 4:
        spo_feat = spo_feat.reshape(spo_feat.shape[0], spo_feat.shape[1])
    bf16 = jnp.bfloat16
    f32 = jnp.float32
    lrelu = lambda x: jnp.where(x > 0, x, LEAKY_SLOPE * x)
    dot = lambda a, b: jnp.dot(a.astype(bf16), b.astype(bf16),
                               preferred_element_type=f32)
    h1 = lrelu(dot(spo_feat, params["w1"]) + params["b1"])
    prd = lrelu(dot(h1, params["w2"]) + params["b2"])
    s1 = lrelu(dot(spt_feat, params["w3"]) + params["b3"])
    s2 = lrelu(dot(s1, params["w4"]) + params["b4"])
    mix_in = jnp.concatenate([prd, s2], axis=1)
    mix = lrelu(dot(mix_in, params["w5"]) + params["b5"])
    score = dot(mix, params["w6"]) + params["b6"]
    return jax.nn.softmax(score, axis=1)


if __name__ == "__main__":
    key = jax.random.PRNGKey(0)
    k_spo, k_spt, k_par = jax.random.split(key, 3)
    params = init_params(k_par)

    # Case 1: small batch with 4-D spo_feat -> single grid step.
    N1 = 16
    spo1 = jax.random.normal(k_spo, (N1, DIM_IN, 1, 1), jnp.float32)
    spt1 = jax.random.normal(k_spt, (N1, SPT_IN), jnp.float32)
    ttl1 = jax.block_until_ready(reldn_head_forward(spo1, spt1, params)[3])
    ref1 = _reference_forward(spo1, spt1, params)
    assert ttl1.shape == (N1, NUM_PRD_CLASSES)
    assert bool(jnp.allclose(jnp.sum(ttl1, axis=1), 1.0, atol=1e-3))
    assert bool(jnp.allclose(ttl1, ref1, atol=3e-3, rtol=3e-3))

    # Case 2: batch not a tile multiple -> exercises row padding + multi-step grid.
    N2 = 40
    spo2 = jax.random.normal(jax.random.fold_in(k_spo, 1), (N2, DIM_IN), jnp.float32)
    spt2 = jax.random.normal(jax.random.fold_in(k_spt, 1), (N2, SPT_IN), jnp.float32)
    ttl2 = jax.block_until_ready(reldn_head_forward(spo2, spt2, params, tile_n=16)[3])
    ref2 = _reference_forward(spo2, spt2, params)
    assert ttl2.shape == (N2, NUM_PRD_CLASSES)
    assert bool(jnp.allclose(jnp.sum(ttl2, axis=1), 1.0, atol=1e-3))
    assert bool(jnp.allclose(ttl2, ref2, atol=3e-3, rtol=3e-3))

    print("KERNEL_OK")
</pallas_src>

<mosaic_0001>
module attributes {stable_mosaic.version = 11 : i64} {
  func.func @reldn_head_kernel(%arg0: i32, %arg1: memref<16x96xbf16, #tpu.memory_space<vmem>>, %arg2: memref<16x28xbf16, #tpu.memory_space<vmem>>, %arg3: memref<96x48xbf16, #tpu.memory_space<vmem>>, %arg4: memref<1x48xf32, #tpu.memory_space<vmem>>, %arg5: memref<48x32xbf16, #tpu.memory_space<vmem>>, %arg6: memref<1x32xf32, #tpu.memory_space<vmem>>, %arg7: memref<28x64xbf16, #tpu.memory_space<vmem>>, %arg8: memref<1x64xf32, #tpu.memory_space<vmem>>, %arg9: memref<64x64xbf16, #tpu.memory_space<vmem>>, %arg10: memref<1x64xf32, #tpu.memory_space<vmem>>, %arg11: memref<32x1024xbf16, #tpu.memory_space<vmem>>, %arg12: memref<64x1024xbf16, #tpu.memory_space<vmem>>, %arg13: memref<1x1024xf32, #tpu.memory_space<vmem>>, %arg14: memref<1024x128xbf16, #tpu.memory_space<vmem>>, %arg15: memref<1x128xf32, #tpu.memory_space<vmem>>, %arg16: memref<16x128xf32, #tpu.memory_space<vmem>>) attributes {dimension_semantics = [#tpu.dimension_semantics<parallel>], iteration_bounds = array<i64: 1>, scalar_prefetch = 0 : i64, scratch_operands = 0 : i64, tpu.core_type = #tpu.core_type<tc>, window_params = [{transform_indices = @transform_0, window_bounds = array<i64: 16, 96>}, {transform_indices = @transform_1, window_bounds = array<i64: 16, 28>}, {pipeline_mode = #tpu.pipeline_mode<synchronous>, transform_indices = @transform_2, window_bounds = array<i64: 96, 48>}, {pipeline_mode = #tpu.pipeline_mode<synchronous>, transform_indices = @transform_3, window_bounds = array<i64: 1, 48>}, {pipeline_mode = #tpu.pipeline_mode<synchronous>, transform_indices = @transform_4, window_bounds = array<i64: 48, 32>}, {pipeline_mode = #tpu.pipeline_mode<synchronous>, transform_indices = @transform_5, window_bounds = array<i64: 1, 32>}, {pipeline_mode = #tpu.pipeline_mode<synchronous>, transform_indices = @transform_6, window_bounds = array<i64: 28, 64>}, {pipeline_mode = #tpu.pipeline_mode<synchronous>, transform_indices = @transform_7, window_bounds = array<i64: 1, 64>}, {pipeline_mode = #tpu.pipeline_mode<synchronous>, transform_indices = @transform_8, window_bounds = array<i64: 64, 64>}, {pipeline_mode = #tpu.pipeline_mode<synchronous>, transform_indices = @transform_9, window_bounds = array<i64: 1, 64>}, {pipeline_mode = #tpu.pipeline_mode<synchronous>, transform_indices = @transform_10, window_bounds = array<i64: 32, 1024>}, {pipeline_mode = #tpu.pipeline_mode<synchronous>, transform_indices = @transform_11, window_bounds = array<i64: 64, 1024>}, {pipeline_mode = #tpu.pipeline_mode<synchronous>, transform_indices = @transform_12, window_bounds = array<i64: 1, 1024>}, {pipeline_mode = #tpu.pipeline_mode<synchronous>, transform_indices = @transform_13, window_bounds = array<i64: 1024, 128>}, {pipeline_mode = #tpu.pipeline_mode<synchronous>, transform_indices = @transform_14, window_bounds = array<i64: 1, 128>}, {transform_indices = @transform_15, window_bounds = array<i64: 16, 128>}]} {
    %c0 = arith.constant 0 : index
    %c0_0 = arith.constant 0 : index
    %0 = vector.load %arg1[%c0, %c0_0] : memref<16x96xbf16, #tpu.memory_space<vmem>>, vector<16x96xbf16>
    %c0_1 = arith.constant 0 : index
    %c0_2 = arith.constant 0 : index
    %1 = vector.load %arg3[%c0_1, %c0_2] : memref<96x48xbf16, #tpu.memory_space<vmem>>, vector<96x48xbf16>
    %cst = arith.constant dense<0.000000e+00> : vector<16x48xf32>
    %2 = tpu.matmul %0, %1, %cst {dimension_numbers = #tpu.dot_dimension_numbers<[1], [0], [0], [1], [0, 0, 1, 1], [], []>} : vector<16x96xbf16>, vector<96x48xbf16>, vector<16x48xf32> -> vector<16x48xf32>
    %c0_3 = arith.constant 0 : index
    %c0_4 = arith.constant 0 : index
    %3 = vector.load %arg4[%c0_3, %c0_4] : memref<1x48xf32, #tpu.memory_space<vmem>>, vector<1x48xf32>
    %4 = vector.broadcast %3 : vector<1x48xf32> to vector<16x48xf32>
    %5 = arith.addf %2, %4 : vector<16x48xf32>
    %cst_5 = arith.constant 0.000000e+00 : f32
    %6 = vector.broadcast %cst_5 : f32 to vector<16x48xf32>
    %7 = arith.cmpf ogt, %5, %6 : vector<16x48xf32>
    %cst_6 = arith.constant 1.000000e-01 : f32
    %8 = vector.broadcast %cst_6 : f32 to vector<16x48xf32>
    %9 = arith.mulf %8, %5 : vector<16x48xf32>
    %10 = arith.select %7, %5, %9 : vector<16x48xi1>, vector<16x48xf32>
    %11 = arith.truncf %10 : vector<16x48xf32> to vector<16x48xbf16>
    %c0_7 = arith.constant 0 : index
    %c0_8 = arith.constant 0 : index
    %12 = vector.load %arg5[%c0_7, %c0_8] : memref<48x32xbf16, #tpu.memory_space<vmem>>, vector<48x32xbf16>
    %cst_9 = arith.constant dense<0.000000e+00> : vector<16x32xf32>
    %13 = tpu.matmul %11, %12, %cst_9 {dimension_numbers = #tpu.dot_dimension_numbers<[1], [0], [0], [1], [0, 0, 1, 1], [], []>} : vector<16x48xbf16>, vector<48x32xbf16>, vector<16x32xf32> -> vector<16x32xf32>
    %c0_10 = arith.constant 0 : index
    %c0_11 = arith.constant 0 : index
    %14 = vector.load %arg6[%c0_10, %c0_11] : memref<1x32xf32, #tpu.memory_space<vmem>>, vector<1x32xf32>
    %15 = vector.broadcast %14 : vector<1x32xf32> to vector<16x32xf32>
    %16 = arith.addf %13, %15 : vector<16x32xf32>
    %cst_12 = arith.constant 0.000000e+00 : f32
    %17 = vector.broadcast %cst_12 : f32 to vector<16x32xf32>
    %18 = arith.cmpf ogt, %16, %17 : vector<16x32xf32>
    %cst_13 = arith.constant 1.000000e-01 : f32
    %19 = vector.broadcast %cst_13 : f32 to vector<16x32xf32>
    %20 = arith.mulf %19, %16 : vector<16x32xf32>
    %21 = arith.select %18, %16, %20 : vector<16x32xi1>, vector<16x32xf32>
    %c0_14 = arith.constant 0 : index
    %c0_15 = arith.constant 0 : index
    %22 = vector.load %arg2[%c0_14, %c0_15] : memref<16x28xbf16, #tpu.memory_space<vmem>>, vector<16x28xbf16>
    %c0_16 = arith.constant 0 : index
    %c0_17 = arith.constant 0 : index
    %23 = vector.load %arg7[%c0_16, %c0_17] : memref<28x64xbf16, #tpu.memory_space<vmem>>, vector<28x64xbf16>
    %cst_18 = arith.constant dense<0.000000e+00> : vector<16x64xf32>
    %24 = tpu.matmul %22, %23, %cst_18 {dimension_numbers = #tpu.dot_dimension_numbers<[1], [0], [0], [1], [0, 0, 1, 1], [], []>} : vector<16x28xbf16>, vector<28x64xbf16>, vector<16x64xf32> -> vector<16x64xf32>
    %c0_19 = arith.constant 0 : index
    %c0_20 = arith.constant 0 : index
    %25 = vector.load %arg8[%c0_19, %c0_20] : memref<1x64xf32, #tpu.memory_space<vmem>>, vector<1x64xf32>
    %26 = vector.broadcast %25 : vector<1x64xf32> to vector<16x64xf32>
    %27 = arith.addf %24, %26 : vector<16x64xf32>
    %cst_21 = arith.constant 0.000000e+00 : f32
    %28 = vector.broadcast %cst_21 : f32 to vector<16x64xf32>
    %29 = arith.cmpf ogt, %27, %28 : vector<16x64xf32>
    %cst_22 = arith.constant 1.000000e-01 : f32
    %30 = vector.broadcast %cst_22 : f32 to vector<16x64xf32>
    %31 = arith.mulf %30, %27 : vector<16x64xf32>
    %32 = arith.select %29, %27, %31 : vector<16x64xi1>, vector<16x64xf32>
    %33 = arith.truncf %32 : vector<16x64xf32> to vector<16x64xbf16>
    %c0_23 = arith.constant 0 : index
    %c0_24 = arith.constant 0 : index
    %34 = vector.load %arg9[%c0_23, %c0_24] : memref<64x64xbf16, #tpu.memory_space<vmem>>, vector<64x64xbf16>
    %cst_25 = arith.constant dense<0.000000e+00> : vector<16x64xf32>
    %35 = tpu.matmul %33, %34, %cst_25 {dimension_numbers = #tpu.dot_dimension_numbers<[1], [0], [0], [1], [0, 0, 1, 1], [], []>} : vector<16x64xbf16>, vector<64x64xbf16>, vector<16x64xf32> -> vector<16x64xf32>
    %c0_26 = arith.constant 0 : index
    %c0_27 = arith.constant 0 : index
    %36 = vector.load %arg10[%c0_26, %c0_27] : memref<1x64xf32, #tpu.memory_space<vmem>>, vector<1x64xf32>
    %37 = vector.broadcast %36 : vector<1x64xf32> to vector<16x64xf32>
    %38 = arith.addf %35, %37 : vector<16x64xf32>
    %cst_28 = arith.constant 0.000000e+00 : f32
    %39 = vector.broadcast %cst_28 : f32 to vector<16x64xf32>
    %40 = arith.cmpf ogt, %38, %39 : vector<16x64xf32>
    %cst_29 = arith.constant 1.000000e-01 : f32
    %41 = vector.broadcast %cst_29 : f32 to vector<16x64xf32>
    %42 = arith.mulf %41, %38 : vector<16x64xf32>
    %43 = arith.select %40, %38, %42 : vector<16x64xi1>, vector<16x64xf32>
    %44 = arith.truncf %21 : vector<16x32xf32> to vector<16x32xbf16>
    %c0_30 = arith.constant 0 : index
    %c0_31 = arith.constant 0 : index
    %45 = vector.load %arg11[%c0_30, %c0_31] : memref<32x1024xbf16, #tpu.memory_space<vmem>>, vector<32x1024xbf16>
    %cst_32 = arith.constant dense<0.000000e+00> : vector<16x1024xf32>
    %46 = tpu.matmul %44, %45, %cst_32 {dimension_numbers = #tpu.dot_dimension_numbers<[1], [0], [0], [1], [0, 0, 1, 1], [], []>} : vector<16x32xbf16>, vector<32x1024xbf16>, vector<16x1024xf32> -> vector<16x1024xf32>
    %47 = arith.truncf %43 : vector<16x64xf32> to vector<16x64xbf16>
    %c0_33 = arith.constant 0 : index
    %c0_34 = arith.constant 0 : index
    %48 = vector.load %arg12[%c0_33, %c0_34] : memref<64x1024xbf16, #tpu.memory_space<vmem>>, vector<64x1024xbf16>
    %cst_35 = arith.constant dense<0.000000e+00> : vector<16x1024xf32>
    %49 = tpu.matmul %47, %48, %cst_35 {dimension_numbers = #tpu.dot_dimension_numbers<[1], [0], [0], [1], [0, 0, 1, 1], [], []>} : vector<16x64xbf16>, vector<64x1024xbf16>, vector<16x1024xf32> -> vector<16x1024xf32>
    %50 = arith.addf %46, %49 : vector<16x1024xf32>
    %c0_36 = arith.constant 0 : index
    %c0_37 = arith.constant 0 : index
    %51 = vector.load %arg13[%c0_36, %c0_37] : memref<1x1024xf32, #tpu.memory_space<vmem>>, vector<1x1024xf32>
    %52 = vector.broadcast %51 : vector<1x1024xf32> to vector<16x1024xf32>
    %53 = arith.addf %50, %52 : vector<16x1024xf32>
    %cst_38 = arith.constant 0.000000e+00 : f32
    %54 = vector.broadcast %cst_38 : f32 to vector<16x1024xf32>
    %55 = arith.cmpf ogt, %53, %54 : vector<16x1024xf32>
    %cst_39 = arith.constant 1.000000e-01 : f32
    %56 = vector.broadcast %cst_39 : f32 to vector<16x1024xf32>
    %57 = arith.mulf %56, %53 : vector<16x1024xf32>
    %58 = arith.select %55, %53, %57 : vector<16x1024xi1>, vector<16x1024xf32>
    %59 = arith.truncf %58 : vector<16x1024xf32> to vector<16x1024xbf16>
    %c0_40 = arith.constant 0 : index
    %c0_41 = arith.constant 0 : index
    %60 = vector.load %arg14[%c0_40, %c0_41] : memref<1024x128xbf16, #tpu.memory_space<vmem>>, vector<1024x128xbf16>
    %cst_42 = arith.constant dense<0.000000e+00> : vector<16x128xf32>
    %61 = tpu.matmul %59, %60, %cst_42 {dimension_numbers = #tpu.dot_dimension_numbers<[1], [0], [0], [1], [0, 0, 1, 1], [], []>} : vector<16x1024xbf16>, vector<1024x128xbf16>, vector<16x128xf32> -> vector<16x128xf32>
    %c0_43 = arith.constant 0 : index
    %c0_44 = arith.constant 0 : index
    %62 = vector.load %arg15[%c0_43, %c0_44] : memref<1x128xf32, #tpu.memory_space<vmem>>, vector<1x128xf32>
    %63 = vector.broadcast %62 : vector<1x128xf32> to vector<16x128xf32>
    %64 = arith.addf %61, %63 : vector<16x128xf32>
    %cst_45 = arith.constant dense<0xFF800000> : vector<16xf32>
    %65 = vector.multi_reduction <maximumf>, %64, %cst_45 [1] : vector<16x128xf32> to vector<16xf32>
    %66 = vector.shape_cast %65 : vector<16xf32> to vector<16x1xf32>
    %67 = vector.broadcast %66 : vector<16x1xf32> to vector<16x128xf32>
    %68 = arith.subf %64, %67 : vector<16x128xf32>
    %69 = math.exp %68 : vector<16x128xf32>
    %cst_46 = arith.constant dense<0.000000e+00> : vector<16xf32>
    %70 = vector.multi_reduction <add>, %69, %cst_46 [1] : vector<16x128xf32> to vector<16xf32>
    %71 = vector.shape_cast %70 : vector<16xf32> to vector<16x1xf32>
    %72 = vector.broadcast %71 : vector<16x1xf32> to vector<16x128xf32>
    %73 = arith.divf %69, %72 : vector<16x128xf32>
    %c0_47 = arith.constant 0 : index
    %c0_48 = arith.constant 0 : index
    %74 = vector.load %arg16[%c0_47, %c0_48] : memref<16x128xf32, #tpu.memory_space<vmem>>, vector<16x128xf32>
    tpu.vector_store %arg16[%c0_47, %c0_48], %73 {strides = array<i32>} : memref<16x128xf32, #tpu.memory_space<vmem>>, vector<16x128xf32>,
    return
  }
  func.func @transform_0(%arg0: i32) -> (i32, i32) {
    %c0_i32 = arith.constant 0 : i32
    %c0_i32_0 = arith.constant 0 : i32
    return %arg0, %c0_i32 : i32, i32
  }
  func.func @transform_1(%arg0: i32) -> (i32, i32) {
    %c0_i32 = arith.constant 0 : i32
    %c0_i32_0 = arith.constant 0 : i32
    return %arg0, %c0_i32 : i32, i32
  }
  func.func @transform_2(%arg0: i32) -> (i32, i32) {
    %c0_i32 = arith.constant 0 : i32
    %c0_i32_0 = arith.constant 0 : i32
    %c0_i32_1 = arith.constant 0 : i32
    return %c0_i32, %c0_i32_0 : i32, i32
  }
  func.func @transform_3(%arg0: i32) -> (i32, i32) {
    %c0_i32 = arith.constant 0 : i32
    %c0_i32_0 = arith.constant 0 : i32
    %c0_i32_1 = arith.constant 0 : i32
    return %c0_i32, %c0_i32_0 : i32, i32
  }
  func.func @transform_4(%arg0: i32) -> (i32, i32) {
    %c0_i32 = arith.constant 0 : i32
    %c0_i32_0 = arith.constant 0 : i32
    %c0_i32_1 = arith.constant 0 : i32
    return %c0_i32, %c0_i32_0 : i32, i32
  }
  func.func @transform_5(%arg0: i32) -> (i32, i32) {
    %c0_i32 = arith.constant 0 : i32
    %c0_i32_0 = arith.constant 0 : i32
    %c0_i32_1 = arith.constant 0 : i32
    return %c0_i32, %c0_i32_0 : i32, i32
  }
  func.func @transform_6(%arg0: i32) -> (i32, i32) {
    %c0_i32 = arith.constant 0 : i32
    %c0_i32_0 = arith.constant 0 : i32
    %c0_i32_1 = arith.constant 0 : i32
    return %c0_i32, %c0_i32_0 : i32, i32
  }
  func.func @transform_7(%arg0: i32) -> (i32, i32) {
    %c0_i32 = arith.constant 0 : i32
    %c0_i32_0 = arith.constant 0 : i32
    %c0_i32_1 = arith.constant 0 : i32
    return %c0_i32, %c0_i32_0 : i32, i32
  }
  func.func @transform_8(%arg0: i32) -> (i32, i32) {
    %c0_i32 = arith.constant 0 : i32
    %c0_i32_0 = arith.constant 0 : i32
    %c0_i32_1 = arith.constant 0 : i32
    return %c0_i32, %c0_i32_0 : i32, i32
  }
  func.func @transform_9(%arg0: i32) -> (i32, i32) {
    %c0_i32 = arith.constant 0 : i32
    %c0_i32_0 = arith.constant 0 : i32
    %c0_i32_1 = arith.constant 0 : i32
    return %c0_i32, %c0_i32_0 : i32, i32
  }
  func.func @transform_10(%arg0: i32) -> (i32, i32) {
    %c0_i32 = arith.constant 0 : i32
    %c0_i32_0 = arith.constant 0 : i32
    %c0_i32_1 = arith.constant 0 : i32
    return %c0_i32, %c0_i32_0 : i32, i32
  }
  func.func @transform_11(%arg0: i32) -> (i32, i32) {
    %c0_i32 = arith.constant 0 : i32
    %c0_i32_0 = arith.constant 0 : i32
    %c0_i32_1 = arith.constant 0 : i32
    return %c0_i32, %c0_i32_0 : i32, i32
  }
  func.func @transform_12(%arg0: i32) -> (i32, i32) {
    %c0_i32 = arith.constant 0 : i32
    %c0_i32_0 = arith.constant 0 : i32
    %c0_i32_1 = arith.constant 0 : i32
    return %c0_i32, %c0_i32_0 : i32, i32
  }
  func.func @transform_13(%arg0: i32) -> (i32, i32) {
    %c0_i32 = arith.constant 0 : i32
    %c0_i32_0 = arith.constant 0 : i32
    %c0_i32_1 = arith.constant 0 : i32
    return %c0_i32, %c0_i32_0 : i32, i32
  }
  func.func @transform_14(%arg0: i32) -> (i32, i32) {
    %c0_i32 = arith.constant 0 : i32
    %c0_i32_0 = arith.constant 0 : i32
    %c0_i32_1 = arith.constant 0 : i32
    return %c0_i32, %c0_i32_0 : i32, i32
  }
  func.func @transform_15(%arg0: i32) -> (i32, i32) {
    %c0_i32 = arith.constant 0 : i32
    %c0_i32_0 = arith.constant 0 : i32
    return %arg0, %c0_i32 : i32, i32
  }
}

</mosaic_0001>

<bundles_post_ra>
// kernel: tpu_custom_call.1
= control target key start
LH: loop header
LB: loop body
LE: loop exit
PB: predicated region body
PF: predicated region fallthrough
CT: control target
= control target key end

     0   :  { %20 = vsyncpa [#allocation3], 0  ;;  %s3045_s0 = inlined_call_operand.hbm [shape: bf16[16,96], index: 0, kind: input, shape index: {}]   ;;  %s3046_s1 = inlined_call_operand.hbm [shape: bf16[16,28], index: 1, kind: input, shape index: {}]   ;;  %s3047_s2 = inlined_call_operand.vmem [shape: bf16[96,48], index: 2, kind: input, shape index: {}]   ;;  %s3048_s3 = inlined_call_operand.vmem [shape: f32[1,48], index: 3, kind: input, shape index: {}]   ;;  %s3049_s4 = inlined_call_operand.vmem [shape: bf16[48,32], index: 4, kind: input, shape index: {}]   ;;  %s3050_s5 = inlined_call_operand.hbm [shape: f32[1,32], index: 5, kind: input, shape index: {}]   ;;  %s3051_s6 = inlined_call_operand.vmem [shape: bf16[28,64], index: 6, kind: input, shape index: {}]   ;;  %s3052_s7 = inlined_call_operand.hbm [shape: f32[1,64], index: 7, kind: input, shape index: {}]   ;;  %s3053_s8 = inlined_call_operand.hbm [shape: bf16[64,64], index: 8, kind: input, shape index: {}]   ;;  %s3054_s9 = inlined_call_operand.hbm [shape: f32[1,64], index: 9, kind: input, shape index: {}]   ;;  %s3055_s10 = inlined_call_operand.vmem [shape: bf16[32,1024], index: 10, kind: input, shape index: {}]   ;;  %s3056_s11 = inlined_call_operand.hbm [shape: bf16[64,1024], index: 11, kind: input, shape index: {}]   ;;  %s3057_s12 = inlined_call_operand.vmem [shape: f32[1,1024], index: 12, kind: input, shape index: {}]   ;;  %s3058_s13 = inlined_call_operand.hbm [shape: bf16[1024,128], index: 13, kind: input, shape index: {}]   ;;  %s3059_s14 = inlined_call_operand.vmem [shape: f32[1,128], index: 14, kind: input, shape index: {}]   ;;  %s3060_s15 = inlined_call_operand.hbm [shape: f32[16,128], index: 15, kind: output, shape index: {}]  }
   0x1   :  { %21 = vsyncpa [#allocation6], 0 }
   0x2   :  { %22 = vsyncpa [#allocation9], 0 }
   0x3   :  { %23 = vsyncpa [#allocation12], 0 }
   0x4   :  { %24 = vsyncpa [#allocation15], 0 }
   0x5   :  { %25 = vsyncpa [#allocation4], 0  ;;  %s2637_s18 = smov [#allocation5]   ;;  %s2638_s20 = smov [#allocation8]  }
   0x6   :  { %s43_s19 = sshll.u32 %s2637_s18, 4  ;;  %s74_s21 = sshll.u32 %s2638_s20, 4  ;;  %s44_s19 = int_to_ptr.vmem [resolvable:$true] %s43_s19  ;;  %s2735_s21 = int_to_ptr.vmem [resolvable:$true] %s74_s21 }
   0x7   :  { %s2427_s24 = scalar_lea.hbm %s3046_s1, 128 }
   0x8   :  { %p2428_p0 = scmp.ne.s32.totalorder %s3046_s1, %s2427_s24  ;;  %p2431_p1 = scmp.lt.u32.totalorder %s2427_s24, %s3046_s1 }
   0xa   :  { %p2433_p2 = pnand %p2431_p1, %p2428_p0 }
   0xc   :  { %2436 = shalt.err (!%p2433_p2)
}
   0xd   :  { %s2437_s29 = scalar_lea.vmem %s44_s19, 128  ;;  %p2442_p4 = scmp.lt.s32.totalorder %s44_s19, %s44_s19 }
   0xe   :  { %p2438_p3 = scmp.ne.s32.totalorder %s44_s19, %s2437_s29  ;;  %p2443_p5 = scmp.lt.s32.totalorder %s2437_s29, %s2437_s29 }
  0x10   :  { %p2444_p6 = por %p2443_p5, %p2442_p4 }
  0x12   :  { %p2445_p7 = pnand %p2444_p6, %p2438_p3 }
  0x14   :  { %2448 = shalt.err (!%p2445_p7)
}
  0x15   :  { %s2639_s30 = smov 64   ;;  %s2640_s16 = smov 4  }
  0x16   :  { %49 = dma.hbm_to_vmem [thread:$0]  %s3046_s1, 128, %s44_s19, [#allocation6], %s2639_s30, %s2639_s30, %s2640_s16  }
  0x17   :  { %s2449_s23 = scalar_lea.hbm %s3052_s7, 16 }
  0x18   :  { %p2450_p8 = scmp.ne.s32.totalorder %s3052_s7, %s2449_s23  ;;  %p2453_p9 = scmp.lt.u32.totalorder %s2449_s23, %s3052_s7 }
  0x1a   :  { %p2455_p10 = pnand %p2453_p9, %p2450_p8 }
  0x1c   :  { %2458 = shalt.err (!%p2455_p10)
}
  0x1d   :  { %s2459_s28 = scalar_lea.vmem %s2735_s21, 16  ;;  %s2463_s1 = scalar_lea.vmem %s2735_s21, 32 }
  0x1e   :  { %p2460_p11 = scmp.ne.s32.totalorder %s2735_s21, %s2459_s28  ;;  %p2464_p12 = scmp.lt.s32.totalorder %s2735_s21, %s2735_s21 }
  0x1f   :  { %p2465_p13 = scmp.lt.s32.totalorder %s2463_s1, %s2459_s28 }
  0x21   :  { %p2466_p0 = por %p2465_p13, %p2464_p12 }
  0x23   :  { %p2467_p1 = pnand %p2466_p0, %p2460_p11 }
  0x25   :  { %2470 = shalt.err (!%p2467_p1)
}
  0x26   :  { %77 = dma.hbm_to_vmem [thread:$0]  %s3052_s7, 16, %s2735_s21, [#allocation9]  }
  0x27   :  { %s2641_s17 = smov [#allocation11]   ;;  %s2642_s20 = smov [#allocation2]  }
  0x28   :  { %s96_s18 = sshll.u32 %s2641_s17, 4  ;;  %s31_s22 = sshll.u32 %s2642_s20, 4  ;;  %s97_s18 = int_to_ptr.vmem [resolvable:$true] %s96_s18  ;;  %s2770_s22 = int_to_ptr.vmem [resolvable:$true] %s31_s22 }
  0x29   :  { %s2471_s25 = scalar_lea.hbm %s3054_s9, 16 }
  0x2a   :  { %p2472_p2 = scmp.ne.s32.totalorder %s3054_s9, %s2471_s25  ;;  %p2475_p3 = scmp.lt.u32.totalorder %s2471_s25, %s3054_s9 }
  0x2c   :  { %p2477_p4 = pnand %p2475_p3, %p2472_p2 }
  0x2e   :  { %2480 = shalt.err (!%p2477_p4)
}
  0x2f   :  { %s2481_s7 = scalar_lea.vmem %s97_s18, 16  ;;  %s2485_s21 = scalar_lea.vmem %s97_s18, 32 }
  0x30   :  { %p2482_p5 = scmp.ne.s32.totalorder %s97_s18, %s2481_s7  ;;  %p2486_p6 = scmp.lt.s32.totalorder %s97_s18, %s97_s18 }
  0x31   :  { %p2487_p7 = scmp.lt.s32.totalorder %s2485_s21, %s2481_s7 }
  0x33   :  { %p2488_p8 = por %p2487_p7, %p2486_p6 }
  0x35   :  { %p2489_p9 = pnand %p2488_p8, %p2482_p5 }
  0x37   :  { %2492 = shalt.err (!%p2489_p9)
}
  0x38   :  { %99 = dma.hbm_to_vmem [thread:$0]  %s3054_s9, 16, %s97_s18, [#allocation12]  }
  0x39   :  { %s2493_s23 = scalar_lea.hbm %s3045_s0, 128 }
  0x3a   :  { %p2494_p10 = scmp.ne.s32.totalorder %s3045_s0, %s2493_s23  ;;  %p2497_p11 = scmp.lt.u32.totalorder %s2493_s23, %s3045_s0 }
  0x3c   :  { %p2499_p12 = pnand %p2497_p11, %p2494_p10 }
  0x3e   :  { %2502 = shalt.err (!%p2499_p12)
}
  0x3f   :  { %s2503_s28 = scalar_lea.vmem %s2770_s22, 128  ;;  %p2508_p0 = scmp.lt.s32.totalorder %s2770_s22, %s2770_s22 }
  0x40   :  { %p2504_p13 = scmp.ne.s32.totalorder %s2770_s22, %s2503_s28  ;;  %p2509_p1 = scmp.lt.s32.totalorder %s2503_s28, %s2503_s28 }
  0x42   :  { %p2510_p2 = por %p2509_p1, %p2508_p0 }
  0x44   :  { %p2511_p3 = pnand %p2510_p2, %p2504_p13 }
  0x46   :  { %2514 = shalt.err (!%p2511_p3)
}
  0x47   :  { %37 = dma.hbm_to_vmem [thread:$0]  %s3045_s0, 128, %s2770_s22, [#allocation3], %s2639_s30, %s2639_s30, %s2640_s16  }
  0x48   :  { %s2643_s1 = smov [#allocation7]   ;;  %s2644_s21 = smov [#allocation10]  }
  0x49   :  { %s62_s7 = sshll.u32 %s2643_s1, 4  ;;  %s83_s19 = sshll.u32 %s2644_s21, 4  ;;  %s63_s7 = int_to_ptr.vmem [resolvable:$true] %s62_s7  ;;  %s2804_s19 = int_to_ptr.vmem [resolvable:$true] %s83_s19 }
  0x4a   :  { %s2515_s20 = scalar_lea.hbm %s3050_s5, 16 }
  0x4b   :  { %p2516_p4 = scmp.ne.s32.totalorder %s3050_s5, %s2515_s20  ;;  %p2519_p5 = scmp.lt.u32.totalorder %s2515_s20, %s3050_s5 }
  0x4d   :  { %p2521_p6 = pnand %p2519_p5, %p2516_p4 }
  0x4f   :  { %2524 = shalt.err (!%p2521_p6)
}
  0x50   :  { %s2525_s0 = scalar_lea.vmem %s63_s7, 16  ;;  %s2529_s22 = scalar_lea.vmem %s63_s7, 32 }
  0x51   :  { %p2526_p7 = scmp.ne.s32.totalorder %s63_s7, %s2525_s0  ;;  %p2530_p8 = scmp.lt.s32.totalorder %s63_s7, %s63_s7 }
  0x52   :  { %p2531_p9 = scmp.lt.s32.totalorder %s2529_s22, %s2525_s0 }
  0x54   :  { %p2532_p10 = por %p2531_p9, %p2530_p8 }
  0x56   :  { %p2533_p11 = pnand %p2532_p10, %p2526_p7 }
  0x58   :  { %2536 = shalt.err (!%p2533_p11)
}
  0x59   :  { %65 = dma.hbm_to_vmem [thread:$0]  %s3050_s5, 16, %s63_s7, [#allocation6]  }
  0x5a   :  { %s2537_s1 = scalar_lea.hbm %s3053_s8, 512 }
  0x5b   :  { %p2538_p12 = scmp.ne.s32.totalorder %s3053_s8, %s2537_s1  ;;  %p2541_p13 = scmp.lt.u32.totalorder %s2537_s1, %s3053_s8 }
  0x5d   :  { %p2543_p0 = pnand %p2541_p13, %p2538_p12 }
  0x5f   :  { %2546 = shalt.err (!%p2543_p0)
}
  0x60   :  { %s2547_s23 = scalar_lea.vmem %s2804_s19, 512  ;;  %p2552_p2 = scmp.lt.s32.totalorder %s2804_s19, %s2804_s19 }
  0x61   :  { %p2548_p1 = scmp.ne.s32.totalorder %s2804_s19, %s2547_s23  ;;  %p2553_p3 = scmp.lt.s32.totalorder %s2547_s23, %s2547_s23 }
  0x63   :  { %p2554_p4 = por %p2553_p3, %p2552_p2 }
  0x65   :  { %p2555_p5 = pnand %p2554_p4, %p2548_p1 }
  0x67   :  { %2558 = shalt.err (!%p2555_p5)
}
  0x68   :  { %89 = dma.hbm_to_vmem [thread:$0]  %s3053_s8, 512, %s2804_s19, [#allocation9], %s2639_s30, %s2639_s30, %s2640_s16  }
  0x69   :  { %s2645_s24 = smov [#allocation13]   ;;  %s2559_s22 = scalar_lea.hbm %s3056_s11, 4096 }
  0x6a   :  { %s107_s25 = sshll.u32 %s2645_s24, 4  ;;  %p2560_p6 = scmp.ne.s32.totalorder %s3056_s11, %s2559_s22  ;;  %s108_s25 = int_to_ptr.vmem [resolvable:$true] %s107_s25 }
  0x6b   :  { %p2563_p7 = scmp.lt.u32.totalorder %s2559_s22, %s3056_s11 }
  0x6d   :  { %p2565_p8 = pnand %p2563_p7, %p2560_p6 }
  0x6f   :  { %2568 = shalt.err (!%p2565_p8)
}
  0x70   :  { %s2569_s1 = scalar_lea.vmem %s108_s25, 4096  ;;  %p2574_p10 = scmp.lt.s32.totalorder %s108_s25, %s108_s25 }
  0x71   :  { %p2570_p9 = scmp.ne.s32.totalorder %s108_s25, %s2569_s1  ;;  %p2575_p11 = scmp.lt.s32.totalorder %s2569_s1, %s2569_s1 }
  0x73   :  { %p2576_p12 = por %p2575_p11, %p2574_p10 }
  0x75   :  { %p2577_p13 = pnand %p2576_p12, %p2570_p9 }
  0x77   :  { %2580 = shalt.err (!%p2577_p13)
}
  0x78   :  { %s2646_s8 = smov 512   ;;  %s2647_s19 = smov 32  }
  0x79   :  { %113 = dma.hbm_to_vmem [thread:$0]  %s3056_s11, 4096, %s108_s25, [#allocation12], %s2646_s8, %s2646_s8, %s2647_s19  }
  0x7a   :  { %s2648_s17 = smov [#allocation14]   ;;  %s2581_s7 = scalar_lea.hbm %s3058_s13, 8192 }
  0x7b   :  { %s121_s20 = sshll.u32 %s2648_s17, 4  ;;  %p2582_p0 = scmp.ne.s32.totalorder %s3058_s13, %s2581_s7  ;;  %s122_s20 = int_to_ptr.vmem [resolvable:$true] %s121_s20 }
  0x7c   :  { %p2585_p1 = scmp.lt.u32.totalorder %s2581_s7, %s3058_s13 }
  0x7e   :  { %p2587_p2 = pnand %p2585_p1, %p2582_p0 }
  0x80   :  { %2590 = shalt.err (!%p2587_p2)
}
  0x81   :  { %s2591_s27 = scalar_lea.vmem %s122_s20, 8192  ;;  %p2596_p4 = scmp.lt.s32.totalorder %s122_s20, %s122_s20 }
  0x82   :  { %p2592_p3 = scmp.ne.s32.totalorder %s122_s20, %s2591_s27  ;;  %p2597_p5 = scmp.lt.s32.totalorder %s2591_s27, %s2591_s27 }
  0x84   :  { %p2598_p6 = por %p2597_p5, %p2596_p4 }
  0x86   :  { %p2599_p7 = pnand %p2598_p6, %p2592_p3 }
  0x88   :  { %2602 = shalt.err (!%p2599_p7)
}
  0x89   :  { %127 = dma.hbm_to_vmem [thread:$0]  %s3058_s13, 8192, %s122_s20, [#allocation15], %s2639_s30, %s2639_s30, %s2640_s16  }
  0x8a   :  { %2625 = dma.done.wait [#allocation3], 128  }
  0x8b   :  { %2626 = vsyncadd [#allocation3], 4294967168 }
  0x8c   :  { %2627 = dma.done.wait [#allocation6], 144  }
  0x8d   :  { %2628 = vsyncadd [#allocation6], 4294967152 }
  0x8e   :  { %2629 = dma.done.wait [#allocation9], 528  }
  0x8f   :  { %2630 = vsyncadd [#allocation9], 4294966768 }
  0x90   :  { %2631 = dma.done.wait [#allocation12], 4112  }
  0x91   :  { %2632 = vsyncadd [#allocation12], 4294963184 }
  0x92   :  { %2633 = dma.done.wait [#allocation15], 8192  }
  0x93   :  { %2634 = vsyncadd [#allocation15], 4294959104  ;;  %v2649_v0 = vmov 0.0   ;;  %vm2650_vm0 = vmmov 0   ;;  %v2338_v1 = vld [vmem:[%s3047_s2] sm:$0xff]   ;;  %v2339_v2 = vld [vmem:[%s3047_s2 + $0x8] sm:$0xff]  }
  0x94   :  { %2258 = vmatprep.subr.bf16.mxu0 %v2649_v0  ;;  %2270 = vmatprep.mubr.msk.bf16.mxu0 %vm2650_vm0, %v2649_v0  ;;  %v2340_v3 = vld [vmem:[%s3047_s2 + $0x10] sm:$0xff]   ;;  %vm384_vm1 = vcmask 1045504   ;;  %v2346_v4 = vld [vmem:[%s3051_s6 + $0x8] sm:$0x3f]   ;;  %v2341_v5 = vld [vmem:[%s3047_s2 + $0x18] sm:$0xff]   ;;  %vm217_vm2 = vcmask 785408  }
  0x95   :  { %2274 = vmatprep.subr.bf16.mxu1 %v2649_v0  ;;  %2280 = vmatprep.mubr.msk.bf16.mxu1 %vm2650_vm0, %v2649_v0  ;;  %v2348_v6 = vld [vmem:[%s3049_s4] sm:$0xff]   ;;  %v386_v7 = vsel %vm384_vm1, %v2346_v4, 0  ;;  %v2343_v9 = vld [vmem:[%s3047_s2 + $0x28] sm:$0xff]   ;;  %vm380_vm3 = vcmask 228352   ;;  %v2350_v14 = vld [vmem:[%s3049_s4 + $0x10] sm:$0xff]   ;;  %vm300_vm6 = vcmask 392192  }
  0x96   :  { %2259 = vmatpush3.bf16.msra.mxu0 %v2338_v1  ;;  %v2342_v8 = vld [vmem:[%s3047_s2 + $0x20] sm:$0xff]   ;;  %2275 = vmatpush3.bf16.msra.mxu1 %v2348_v6  ;;  %v2347_v12 = vld [vmem:[#allocation5] sm:$0xff]   ;;  %v2019_v24 = vld [vmem:[#allocation8] ss:$0 sm:$0xff]  ;;  %vm475_vm9 = vcmask 523264   ;;  %vm991_vm14 = vcmask 261120  }
  0x97   :  { %2260 = vmatprep.subr.bf16.mxu0 %v2649_v0  ;;  %2276 = vmatprep.subr.bf16.mxu1 %v2649_v0  ;;  %v2344_v10 = vld [vmem:[#allocation2] sm:$0xff]   ;;  %v2349_v13 = vld [vmem:[%s3049_s4 + $0x8] sm:$0xff]   ;;  %v2351_v27 = vld [vmem:[#allocation10] sm:$0xff]  }
  0x98   :  { %v2345_v11 = vld [vmem:[%s3051_s6] sm:$0xff]   ;;  %v2354_v42 = vld [vmem:[#allocation10 + $0x18] sm:$0xff]   ;;  %v544_v43 = vld [vmem:[#allocation13] sm:$0xff] }
  0x99   :  { %v2005_v15 = vld [vmem:[%s3048_s3] ss:$0 sm:$0xff]  ;;  %v2353_v40 = vld [vmem:[#allocation10 + $0x10] sm:$0xff]   ;;  %v548_v44 = vld [vmem:[#allocation13 + $0x20] sm:$0xff] }
  0x9a   :  { %2261 = vmatpush3.bf16.msra.mxu0 %v2339_v2  ;;  %2277 = vmatpush3.bf16.msra.mxu1 %v2349_v13  ;;  %v2352_v35 = vld [vmem:[#allocation10 + $0x8] sm:$0xff]   ;;  %v2031_v46 = vcombine.high %v544_v43, %v548_v44  ;;  %v2030_v48 = vcombine.low %v544_v43, %v548_v44  ;;  %v547_v13 = vld [vmem:[#allocation13 + $0x18] sm:$0xff] }
  0x9b   :  { %2262 = vmatprep.subr.bf16.mxu0 %v2649_v0  ;;  %2278 = vmatprep.subr.bf16.mxu1 %v2649_v0  ;;  %v545_v45 = vld [vmem:[#allocation13 + $0x8] sm:$0xff]  ;;  %v552_v51 = vld [vmem:[#allocation13 + $0x40] sm:$0xff]  ;;  %v555_v43 = vld [vmem:[#allocation13 + $0x58] sm:$0xff] }
  0x9c   :  { %v549_v47 = vld [vmem:[#allocation13 + $0x28] sm:$0xff]  ;;  %v556_v52 = vld [vmem:[#allocation13 + $0x60] sm:$0xff]  ;;  %v559_v44 = vld [vmem:[#allocation13 + $0x78] sm:$0xff] }
  0x9d   :  { %v2032_v49 = vcombine.low %v545_v45, %v549_v47  ;;  %v2033_v50 = vcombine.high %v545_v45, %v549_v47  ;;  %v553_v53 = vld [vmem:[#allocation13 + $0x48] sm:$0xff]  ;;  %v2039_v54 = vcombine.high %v552_v51, %v556_v52  ;;  %v2038_v56 = vcombine.low %v552_v51, %v556_v52  ;;  %v560_v59 = vld [vmem:[#allocation13 + $0x80] sm:$0xff]  ;;  %v566_v51 = vld [vmem:[#allocation13 + $0xb0] sm:$0xff] }
  0x9e   :  { %2263 = vmatpush3.bf16.msra.mxu0 %v2340_v3  ;;  %2279 = vmatpush3.bf16.msra.mxu1 %v2350_v14  ;;  %v557_v55 = vld [vmem:[#allocation13 + $0x68] sm:$0xff]  ;;  %v564_v60 = vld [vmem:[#allocation13 + $0xa0] sm:$0xff]  ;;  %v563_v52 = vld [vmem:[#allocation13 + $0x98] sm:$0xff] }
  0x9f   :  { %2264 = vmatprep.subr.bf16.mxu0 %v2649_v0  ;;  %2292 = vmatprep.subr.bf16.mxu1 %v2649_v0  ;;  %v2041_v57 = vcombine.high %v553_v53, %v557_v55  ;;  %v2040_v58 = vcombine.low %v553_v53, %v557_v55  ;;  %v561_v61 = vld [vmem:[#allocation13 + $0x88] sm:$0xff]  ;;  %v2047_v62 = vcombine.high %v560_v59, %v564_v60  ;;  %v568_v3 = vld [vmem:[#allocation13 + $0xc0] sm:$0xff]  ;;  %v567_v53 = vld [vmem:[#allocation13 + $0xb8] sm:$0xff] }
  0xa0   :  { %v565_v63 = vld [vmem:[#allocation13 + $0xa8] sm:$0xff]  ;;  %v572_v4 = vld [vmem:[#allocation13 + $0xe0] sm:$0xff]  ;;  %v2044_v55 = vcombine.low %v555_v43, %v559_v44 }
  0xa1   :  { %v2048_v1 = vcombine.low %v561_v61, %v565_v63  ;;  %v2049_v2 = vcombine.high %v561_v61, %v565_v63  ;;  %v2055_v6 = vcombine.high %v568_v3, %v572_v4  ;;  %v575_v61 = vld [vmem:[#allocation13 + $0xf8] sm:$0xff]  ;;  %v2052_v63 = vcombine.low %v563_v52, %v567_v53 }
  0xa2   :  { %2265 = vmatpush3.bf16.msra.mxu0 %v2341_v5  ;;  %v569_v5 = vld [vmem:[#allocation13 + $0xc8] sm:$0xff] }
  0xa3   :  { %2266 = vmatprep.subr.bf16.mxu0 %v2649_v0 }
  0xa6   :  { %2267 = vmatpush3.bf16.msra.mxu0 %v2342_v8  ;;  %v2054_v8 = vcombine.low %v568_v3, %v572_v4  ;;  %v531_v3 = vld [vmem:[%s3055_s10 + $0x20] sm:$0xff]  ;;  %v528_v4 = vld [vmem:[%s3055_s10 + $0x8] sm:$0xff] }
  0xa7   :  { %2268 = vmatprep.subr.bf16.mxu0 %v2649_v0 }
  0xaa   :  { %2269 = vmatpush3.bf16.msra.mxu0 %v2343_v9 }
  0xab   :  { %2284 = vmatprep.subr.bf16.mxu0 %v2649_v0 }
  0xad   :  { %2271 = vmatmul.mubr.msk.bf16.vlgmr.msra.gmra.mrb[0].mxu0 %vm217_vm2, %v2344_v10 }
  0xae   :  { %2285 = vmatpush3.bf16.msra.mxu0 %v2345_v11  ;;  %2288 = vmatprep.mubr.msk.bf16.mxu0 %vm2650_vm0, %v2649_v0  ;;  %v546_v11 = vld [vmem:[#allocation13 + $0x10] sm:$0xff] }
  0xaf   :  { %2286 = vmatprep.subr.bf16.mxu0 %v2649_v0 }
  0xb2   :  { %2287 = vmatpush3.bf16.msra.mxu0 %v386_v7  ;;  %v573_v7 = vld [vmem:[#allocation13 + $0xe8] sm:$0xff] }
  0xb3   :  { %739 = vmatprep.subr.bf16.mxu0 %v2031_v46  ;;  %v2056_v9 = vcombine.low %v569_v5, %v573_v7  ;;  %v2057_v10 = vcombine.high %v569_v5, %v573_v7  ;;  %v532_v5 = vld [vmem:[%s3055_s10 + $0x28] sm:$0xff] }
  0xb5   :  { %2289 = vmatmul.mubr.msk.bf16.vlgmr.msra.gmra.mrb[4].mxu0 %vm380_vm3, %v2347_v12  ;;  %v550_v12 = vld [vmem:[#allocation13 + $0x30] sm:$0xff] }
  0xb6   :  { %740 = vmatpush1.bf16.msra.mxu0 %v2030_v48  ;;  %v2035_v14 = vcombine.high %v546_v11, %v550_v12 }
  0xb7   :  { %741 = vmatprep.subr.bf16.mxu0 %v2039_v54 }
  0xba   :  { %742 = vmatpush1.bf16.msra.mxu0 %v2038_v56 }
  0xbb   :  { %743 = vmatprep.subr.bf16.mxu0 %v2047_v62 }
 0x180   :  { %v255_v16 = vpop.f32.mrb[0].mxu0 }
 0x181   :  { %v256_v17 = vadd.f32 %v2005_v15, %v255_v16  ;;  %v2272_v18 = vpop.f32.mrb[1].mxu0  ;;  %v2034_v16 = vcombine.low %v546_v11, %v550_v12  ;;  %v539_v11 = vld [vmem:[%s3055_s10 + $0x60] sm:$0xff]  ;;  %v536_v12 = vld [vmem:[%s3055_s10 + $0x48] sm:$0xff] }
 0x182   :  { %v258_v19 = vpop.f32.mrb[2].mxu0 }
 0x183   :  { %v264_v20 = vmul.f32 0.1, %v256_v17  ;;  %v259_v21 = vadd.f32 %v2005_v15, %v258_v19  ;;  %v2273_v22 = vpop.f32.mrb[3].mxu0  ;;  %vm262_vm4 = vcmp.gt.f32.partialorder %v256_v17, 0.0  ;;  %v551_v15 = vld [vmem:[#allocation13 + $0x38] sm:$0xff]  ;;  %v2651_v19 = vmov 0  }
 0x184   :  { %v2037_v18 = vcombine.high %v547_v13, %v551_v15  ;;  %771 = vmatprep.mubr.bf16.mxu0 %v2651_v19 }
 0x185   :  { %vm263_vm5 = vcmp.gt.f32.partialorder %v259_v21, 0.0  ;;  %v265_v23 = vmul.f32 0.1, %v259_v21  ;;  %v266_v25 = vsel %vm262_vm4, %v256_v17, %v264_v20  ;;  %v2036_v17 = vcombine.low %v547_v13, %v551_v15  ;;  %v2014_v20 = vld [vmem:[#allocation7] ss:$0 sm:$0xff]  ;;  %v540_v13 = vld [vmem:[%s3055_s10 + $0x68] sm:$0xff] }
 0x186   :  { %v2068_v15 = vcombine.low %v528_v4, %v532_v5 }
 0x187   :  { %v267_v26 = vsel %vm263_vm5, %v259_v21, %v265_v23 }
 0x188   :  { %v268_v28 = vpack.c.bf16 %v267_v26, %v266_v25  ;;  %v422_v29 = vpop.f32.mrb[4].mxu0 }
 0x189   :  { %v423_v30 = vadd.f32 %v2019_v24, %v422_v29  ;;  %v2290_v31 = vpop.f32.mrb[5].mxu0 }
 0x18a   :  { %2281 = vmatmul.mubr.msk.bf16.vlgmr.msra.gmra.mrb[0].mxu1 %vm300_vm6, %v268_v28  ;;  %v425_v32 = vpop.f32.mrb[6].mxu0 }
 0x18b   :  { %2293 = vmatpush3.bf16.msra.mxu1 %v2351_v27  ;;  %vm429_vm7 = vcmp.gt.f32.partialorder %v423_v30, 0.0  ;;  %v431_v33 = vmul.f32 0.1, %v423_v30  ;;  %v426_v34 = vadd.f32 %v2019_v24, %v425_v32  ;;  %v2291_v36 = vpop.f32.mrb[7].mxu0  ;;  %2300 = vmatprep.mubr.msk.bf16.mxu1 %vm2650_vm0, %v2649_v0  ;;  %v2024_v32 = vld [vmem:[#allocation11] ss:$0 sm:$0xff] }
 0x18c   :  { %2294 = vmatprep.subr.bf16.mxu1 %v2649_v0 }
 0x18d   :  { %v433_v37 = vsel %vm429_vm7, %v423_v30, %v431_v33  ;;  %vm430_vm8 = vcmp.gt.f32.partialorder %v426_v34, 0.0  ;;  %v432_v38 = vmul.f32 0.1, %v426_v34 }
 0x18f   :  { %v434_v39 = vsel %vm430_vm8, %v426_v34, %v432_v38  ;;  %2295 = vmatpush3.bf16.msra.mxu1 %v2352_v35 }
 0x190   :  { %v435_v41 = vpack.c.bf16 %v434_v39, %v433_v37  ;;  %2296 = vmatprep.subr.bf16.mxu1 %v2649_v0 }
 0x193   :  { %2297 = vmatpush3.bf16.msra.mxu1 %v2353_v40  ;;  %v554_v40 = vld [vmem:[#allocation13 + $0x50] sm:$0xff] }
 0x194   :  { %2298 = vmatprep.subr.bf16.mxu1 %v2649_v0  ;;  %v2046_v0 = vcombine.low %v560_v59, %v564_v60  ;;  %v574_v59 = vld [vmem:[#allocation13 + $0xf0] sm:$0xff]  ;;  %v571_v60 = vld [vmem:[#allocation13 + $0xd8] sm:$0xff] }
 0x195   :  { %v2060_v7 = vcombine.low %v571_v60, %v575_v61 }
 0x196   :  { %744 = vmatpush1.bf16.msra.mxu0 %v2046_v0 }
 0x197   :  { %2299 = vmatpush3.bf16.msra.mxu1 %v2354_v42  ;;  %745 = vmatprep.subr.bf16.mxu0 %v2055_v6  ;;  %v558_v42 = vld [vmem:[#allocation13 + $0x70] sm:$0xff] }
 0x198   :  { %782 = vmatprep.subr.bf16.mxu1 %v2033_v50  ;;  %v2043_v48 = vcombine.high %v554_v40, %v558_v42  ;;  %v562_v50 = vld [vmem:[#allocation13 + $0x90] sm:$0xff]  ;;  %v2042_v54 = vcombine.low %v554_v40, %v558_v42  ;;  %v2357_v40 = vld [vmem:[#allocation14] sm:$0xff]   ;;  %v2359_v42 = vld [vmem:[#allocation14 + $0x48] sm:$0xff]  }
 0x199   :  { %v2051_v56 = vcombine.high %v562_v50, %v566_v51  ;;  %v2050_v62 = vcombine.low %v562_v50, %v566_v51  ;;  %v2368_v50 = vld [vmem:[#allocation14 + $0xd8] sm:$0xff]  }
 0x19a   :  { %2301 = vmatmul.mubr.msk.bf16.vlgmr.msra.gmra.mrb[4].mxu1 %vm475_vm9, %v435_v41  ;;  %746 = vmatpush1.bf16.msra.mxu0 %v2054_v8  ;;  %v2369_v51 = vld [vmem:[#allocation14 + $0x18] sm:$0xff]  }
 0x19b   :  { %783 = vmatpush1.bf16.msra.mxu1 %v2032_v49  ;;  %814 = vmatprep.mubr.bf16.mxu1 %v2651_v19  ;;  %v2045_v49 = vcombine.high %v555_v43, %v559_v44  ;;  %v2360_v43 = vld [vmem:[#allocation14 + $0xc8] sm:$0xff]  }
 0x19c   :  { %784 = vmatprep.subr.bf16.mxu1 %v2041_v57  ;;  %825 = vmatprep.subr.bf16.mxu0 %v2035_v14  ;;  %v2053_v57 = vcombine.high %v563_v52, %v567_v53  ;;  %v2361_v44 = vld [vmem:[#allocation14 + $0x8] sm:$0xff]   ;;  %v2371_v52 = vld [vmem:[#allocation14 + $0x60] sm:$0xff]  }
 0x19d   :  { %v2372_v53 = vld [vmem:[#allocation14 + $0xe0] sm:$0xff]  }
 0x19f   :  { %785 = vmatpush1.bf16.msra.mxu1 %v2040_v58  ;;  %v570_v58 = vld [vmem:[#allocation13 + $0xd0] sm:$0xff] }
 0x1a0   :  { %786 = vmatprep.subr.bf16.mxu1 %v2049_v2  ;;  %v2059_v0 = vcombine.high %v570_v58, %v574_v59  ;;  %v527_v2 = vld [vmem:[%s3055_s10] sm:$0xff]  ;;  %v2058_v6 = vcombine.low %v570_v58, %v574_v59 }
 0x1a1   :  { %v2067_v8 = vcombine.high %v527_v2, %v531_v3  ;;  %v2066_v14 = vcombine.low %v527_v2, %v531_v3  ;;  %v2377_v58 = vld [vmem:[#allocation14 + $0x28] sm:$0xff]   ;;  %v2385_v2 = vld [vmem:[#allocation14 + $0x38] sm:$0xff]  }
 0x1a2   :  { %v2378_v59 = vld [vmem:[#allocation14 + $0xa8] sm:$0xff]   ;;  %v2386_v3 = vld [vmem:[#allocation14 + $0xb8] sm:$0xff]  }
 0x1a3   :  { %787 = vmatpush1.bf16.msra.mxu1 %v2048_v1  ;;  %v2061_v1 = vcombine.high %v571_v60, %v575_v61  ;;  %v2379_v60 = vld [vmem:[#allocation14 + $0x70] sm:$0xff]  }
 0x1a4   :  { %788 = vmatprep.subr.bf16.mxu1 %v2057_v10  ;;  %v535_v10 = vld [vmem:[%s3055_s10 + $0x40] sm:$0xff] }
 0x1a5   :  { %v2380_v61 = vld [vmem:[#allocation14 + $0xf0] sm:$0xff]  }
 0x1a7   :  { %789 = vmatpush1.bf16.msra.mxu1 %v2056_v9  ;;  %v2069_v9 = vcombine.high %v528_v4, %v532_v5  ;;  %v2387_v4 = vld [vmem:[#allocation14 + $0x140] sm:$0xff]  }
 0x1a8   :  { %868 = vmatprep.subr.bf16.mxu1 %v2037_v18  ;;  %v529_v18 = vld [vmem:[%s3055_s10 + $0x10] sm:$0xff] }
 0x1a9   :  { %v2388_v5 = vld [vmem:[#allocation14 + $0x1c0] sm:$0xff]  }
 0x25d   :  { %v338_v21 = vpop.f32.mrb[0].mxu1 }
 0x25e   :  { %v339_v22 = vadd.f32 %v2014_v20, %v338_v21  ;;  %v2282_v23 = vpop.f32.mrb[1].mxu1  ;;  %v530_v21 = vld [vmem:[%s3055_s10 + $0x18] sm:$0xff] }
 0x25f   :  { %v341_v24 = vpop.f32.mrb[2].mxu1  ;;  %v2074_v23 = vcombine.low %v535_v10, %v539_v11 }
 0x260   :  { %v347_v25 = vmul.f32 0.1, %v339_v22  ;;  %v342_v26 = vadd.f32 %v2014_v20, %v341_v24  ;;  %v2283_v27 = vpop.f32.mrb[3].mxu1  ;;  %vm345_vm10 = vcmp.gt.f32.partialorder %v339_v22, 0.0  ;;  %v533_v20 = vld [vmem:[%s3055_s10 + $0x30] sm:$0xff]  ;;  %v2076_v24 = vcombine.low %v536_v12, %v540_v13 }
 0x261   :  { %v537_v27 = vld [vmem:[%s3055_s10 + $0x50] sm:$0xff] }
 0x262   :  { %vm346_vm11 = vcmp.gt.f32.partialorder %v342_v26, 0.0  ;;  %v348_v28 = vmul.f32 0.1, %v342_v26  ;;  %v349_v29 = vsel %vm345_vm10, %v339_v22, %v347_v25  ;;  %v534_v22 = vld [vmem:[%s3055_s10 + $0x38] sm:$0xff]  ;;  %v2071_v25 = vcombine.high %v529_v18, %v533_v20 }
 0x264   :  { %v350_v30 = vsel %vm346_vm11, %v342_v26, %v348_v28  ;;  %v2073_v26 = vcombine.high %v530_v21, %v534_v22  ;;  %v541_v28 = vld [vmem:[%s3055_s10 + $0x70] sm:$0xff] }
 0x265   :  { %v2927_v31 = vpack.c.bf16 %v350_v30, %v349_v29  ;;  %v538_v29 = vld [vmem:[%s3055_s10 + $0x58] sm:$0xff] }
 0x266   :  { %v542_v30 = vld [vmem:[%s3055_s10 + $0x78] sm:$0xff] }
 0x26d   :  { %v513_v33 = vpop.f32.mrb[4].mxu1 }
 0x26e   :  { %v514_v34 = vadd.f32 %v2024_v32, %v513_v33  ;;  %v2302_v35 = vpop.f32.mrb[5].mxu1  ;;  %v2072_v33 = vcombine.low %v530_v21, %v534_v22 }
 0x26f   :  { %v516_v36 = vpop.f32.mrb[6].mxu1  ;;  %v2081_v35 = vcombine.high %v538_v29, %v542_v30 }
 0x270   :  { %v522_v37 = vmul.f32 0.1, %v514_v34  ;;  %v517_v38 = vadd.f32 %v2024_v32, %v516_v36  ;;  %v2303_v39 = vpop.f32.mrb[7].mxu1  ;;  %vm520_vm12 = vcmp.gt.f32.partialorder %v514_v34, 0.0  ;;  %v2070_v32 = vcombine.low %v529_v18, %v533_v20 }
 0x271   :  { %v2078_v36 = vcombine.low %v537_v27, %v541_v28  ;;  %v2356_v39 = vld [vmem:[#allocation14 + $0xc0] sm:$0xff]  }
 0x272   :  { %vm521_vm13 = vcmp.gt.f32.partialorder %v517_v38, 0.0  ;;  %v523_v41 = vmul.f32 0.1, %v517_v38  ;;  %v524_v45 = vsel %vm520_vm12, %v514_v34, %v522_v37  ;;  %v2079_v34 = vcombine.high %v537_v27, %v541_v28 }
 0x273   :  { %v2080_v37 = vcombine.low %v538_v29, %v542_v30 }
 0x274   :  { %v525_v46 = vsel %vm521_vm13, %v517_v38, %v523_v41  ;;  %v2355_v38 = vld [vmem:[#allocation14 + $0x40] sm:$0xff]  }
 0x275   :  { %v543_v47 = vpack.c.bf16 %v525_v46, %v524_v45  ;;  %v2358_v41 = vld [vmem:[#allocation14 + $0x80] sm:$0xff]   ;;  %v2362_v45 = vld [vmem:[#allocation14 + $0x88] sm:$0xff]   ;;  %v2364_v46 = vld [vmem:[#allocation14 + $0xd0] sm:$0xff]  }
 0x277   :  { %2062 = vmatmul.mubr.msk.bf16.vlgmr.msra.gmra.mrb[8].mxu0 %vm475_vm9, %v543_v47  ;;  %2063 = vmatmul.mubr.msk.bf16.vlgmr.msra.gmra.mrb[8].mxu1 %vm475_vm9, %v543_v47 }
 0x278   :  { %826 = vmatpush1.bf16.msra.mxu0 %v2034_v16  ;;  %869 = vmatpush1.bf16.msra.mxu1 %v2036_v17  ;;  %v2075_v16 = vcombine.high %v535_v10, %v539_v11  ;;  %v2077_v17 = vcombine.high %v536_v12, %v540_v13  ;;  %v1167_v10 = vld [vmem:[%s3057_s12] sm:$0xff] }
 0x279   :  { %827 = vmatprep.subr.bf16.mxu0 %v2043_v48  ;;  %870 = vmatprep.subr.bf16.mxu1 %v2045_v49  ;;  %v2366_v48 = vld [vmem:[#allocation14 + $0x90] sm:$0xff]   ;;  %v2367_v49 = vld [vmem:[#allocation14 + $0x58] sm:$0xff]  }
 0x27a   :  { %857 = vmatprep.mubr.bf16.mxu0 %v2651_v19  ;;  %900 = vmatprep.mubr.bf16.mxu1 %v2651_v19 }
 0x27c   :  { %828 = vmatpush1.bf16.msra.mxu0 %v2042_v54  ;;  %871 = vmatpush1.bf16.msra.mxu1 %v2044_v55  ;;  %v2373_v54 = vld [vmem:[#allocation14 + $0x20] sm:$0xff]  }
 0x27d   :  { %829 = vmatprep.subr.bf16.mxu0 %v2051_v56  ;;  %872 = vmatprep.subr.bf16.mxu1 %v2053_v57  ;;  %v2374_v55 = vld [vmem:[#allocation14 + $0xa0] sm:$0xff]   ;;  %v2375_v56 = vld [vmem:[#allocation14 + $0x68] sm:$0xff]  }
 0x27e   :  { %v2376_v57 = vld [vmem:[#allocation14 + $0xe8] sm:$0xff]  }
 0x280   :  { %830 = vmatpush1.bf16.msra.mxu0 %v2050_v62  ;;  %873 = vmatpush1.bf16.msra.mxu1 %v2052_v63  ;;  %v2381_v62 = vld [vmem:[#allocation14 + $0x30] sm:$0xff]  }
 0x281   :  { %831 = vmatprep.subr.bf16.mxu0 %v2059_v0  ;;  %874 = vmatprep.subr.bf16.mxu1 %v2061_v1  ;;  %v2382_v63 = vld [vmem:[#allocation14 + $0xb0] sm:$0xff]   ;;  %v2383_v0 = vld [vmem:[#allocation14 + $0x78] sm:$0xff]  }
 0x282   :  { %v2384_v1 = vld [vmem:[#allocation14 + $0xf8] sm:$0xff]  }
 0x284   :  { %832 = vmatpush1.bf16.msra.mxu0 %v2058_v6  ;;  %875 = vmatpush1.bf16.msra.mxu1 %v2060_v7  ;;  %v1169_v6 = vlaneseq }
 0x285   :  { %995 = vmatprep.subr.bf16.mxu0 %v2067_v8  ;;  %1038 = vmatprep.subr.bf16.mxu1 %v2069_v9 }
 0x286   :  { %v1170_v7 = vshrl.u32 %v1169_v6, 7 }
 0x287   :  { %2064 = vmatmul.mubr.msk.bf16.vlgmr.msra.gmra.mrb[12].mxu0 %vm475_vm9, %v543_v47  ;;  %2065 = vmatmul.mubr.msk.bf16.vlgmr.msra.gmra.mrb[12].mxu1 %vm475_vm9, %v543_v47  ;;  %v2365_v47 = vld [vmem:[#allocation14 + $0x10] sm:$0xff]  }
 0x288   :  { %996 = vmatpush1.bf16.msra.mxu0 %v2066_v14  ;;  %1039 = vmatpush1.bf16.msra.mxu1 %v2068_v15  ;;  %v1171_v8 = vsub.s32 0, %v1170_v7  ;;  %v1179_v9 = vsub.s32 2, %v1170_v7  ;;  %v1175_v11 = vsub.s32 1, %v1170_v7  ;;  %v1183_v12 = vsub.s32 3, %v1170_v7 }
 0x289   :  { %997 = vmatprep.subr.bf16.mxu0 %v2075_v16  ;;  %1040 = vmatprep.subr.bf16.mxu1 %v2077_v17  ;;  %v1187_v17 = vsub.s32 4, %v1170_v7  ;;  %v1195_v18 = vsub.s32 6, %v1170_v7  ;;  %v1191_v22 = vsub.s32 5, %v1170_v7 }
 0x28a   :  { %1027 = vmatprep.mubr.bf16.mxu0 %v2651_v19  ;;  %1070 = vmatprep.mubr.bf16.mxu1 %v2651_v19  ;;  %v1172_v13 = vrot.slane %v1167_v10, %v1171_v8  ;;  %v1180_v14 = vrot.slane %v1167_v10, %v1179_v9  ;;  %v1176_v15 = vrot.slane %v1167_v10, %v1175_v11 }
 0x28b   :  { %v1184_v16 = vrot.slane %v1167_v10, %v1183_v12 }
 0x28c   :  { %998 = vmatpush1.bf16.msra.mxu0 %v2074_v23  ;;  %1041 = vmatpush1.bf16.msra.mxu1 %v2076_v24  ;;  %v1199_v23 = vsub.s32 7, %v1170_v7 }
 0x28d   :  { %1081 = vmatprep.subr.bf16.mxu0 %v2071_v25  ;;  %1124 = vmatprep.subr.bf16.mxu1 %v2073_v26 }
 0x28f   :  { %2082 = vmatmul.mubr.msk.bf16.vlgmr.msra.gmra.mrb[8].mxu0 %vm991_vm14, %v2927_v31  ;;  %2083 = vmatmul.mubr.msk.bf16.vlgmr.msra.gmra.mrb[8].mxu1 %vm991_vm14, %v2927_v31 }
 0x290   :  { %1082 = vmatpush1.bf16.msra.mxu0 %v2070_v32  ;;  %1125 = vmatpush1.bf16.msra.mxu1 %v2072_v33  ;;  %v1188_v33 = vrot.slane %v1167_v10, %v1187_v17 }
 0x291   :  { %1083 = vmatprep.subr.bf16.mxu0 %v2079_v34  ;;  %1126 = vmatprep.subr.bf16.mxu1 %v2081_v35  ;;  %v1196_v34 = vrot.slane %v1167_v10, %v1195_v18 }
 0x292   :  { %1113 = vmatprep.mubr.bf16.mxu0 %v2651_v19  ;;  %1156 = vmatprep.mubr.bf16.mxu1 %v2651_v19  ;;  %v2363_v19 = vld [vmem:[#allocation14 + $0x50] sm:$0xff]  }
 0x294   :  { %1084 = vmatpush1.bf16.msra.mxu0 %v2078_v36  ;;  %1127 = vmatpush1.bf16.msra.mxu1 %v2080_v37 }
 0x295   :  { %2170 = vmatprep.subr.bf16.mxu0 %v2355_v38  ;;  %2192 = vmatprep.subr.bf16.mxu1 %v2356_v39  ;;  %v1192_v38 = vrot.slane %v1167_v10, %v1191_v22  ;;  %v1200_v39 = vrot.slane %v1167_v10, %v1199_v23  ;;  %v2391_v22 = vld [vmem:[#allocation14 + $0x148] sm:$0xff]  }
 0x296   :  { %v2392_v23 = vld [vmem:[#allocation14 + $0x1c8] sm:$0xff]  }
 0x297   :  { %2084 = vmatmul.mubr.msk.bf16.vlgmr.msra.gmra.mrb[12].mxu0 %vm991_vm14, %v2927_v31  ;;  %2085 = vmatmul.mubr.msk.bf16.vlgmr.msra.gmra.mrb[12].mxu1 %vm991_vm14, %v2927_v31  ;;  %v2370_v31 = vld [vmem:[#allocation14 + $0x98] sm:$0xff]  }
 0x298   :  { %2171 = vmatpush3.bf16.msra.mxu0 %v2357_v40  ;;  %2193 = vmatpush3.bf16.msra.mxu1 %v2358_v41 }
 0x299   :  { %2172 = vmatprep.subr.bf16.mxu0 %v2359_v42  ;;  %2194 = vmatprep.subr.bf16.mxu1 %v2360_v43 }
 0x29c   :  { %2173 = vmatpush3.bf16.msra.mxu0 %v2361_v44  ;;  %2195 = vmatpush3.bf16.msra.mxu1 %v2362_v45 }
 0x29d   :  { %2174 = vmatprep.subr.bf16.mxu0 %v2363_v19  ;;  %2196 = vmatprep.subr.bf16.mxu1 %v2364_v46 }
 0x2a0   :  { %2175 = vmatpush3.bf16.msra.mxu0 %v2365_v47  ;;  %2197 = vmatpush3.bf16.msra.mxu1 %v2366_v48 }
 0x2a1   :  { %2176 = vmatprep.subr.bf16.mxu0 %v2367_v49  ;;  %2198 = vmatprep.subr.bf16.mxu1 %v2368_v50 }
 0x2a4   :  { %2177 = vmatpush3.bf16.msra.mxu0 %v2369_v51  ;;  %2199 = vmatpush3.bf16.msra.mxu1 %v2370_v31 }
 0x2a5   :  { %2178 = vmatprep.subr.bf16.mxu0 %v2371_v52  ;;  %2200 = vmatprep.subr.bf16.mxu1 %v2372_v53 }
 0x2a8   :  { %2179 = vmatpush3.bf16.msra.mxu0 %v2373_v54  ;;  %2201 = vmatpush3.bf16.msra.mxu1 %v2374_v55 }
 0x2a9   :  { %2180 = vmatprep.subr.bf16.mxu0 %v2375_v56  ;;  %2202 = vmatprep.subr.bf16.mxu1 %v2376_v57 }
 0x2ac   :  { %2181 = vmatpush3.bf16.msra.mxu0 %v2377_v58  ;;  %2203 = vmatpush3.bf16.msra.mxu1 %v2378_v59 }
 0x2ad   :  { %2182 = vmatprep.subr.bf16.mxu0 %v2379_v60  ;;  %2204 = vmatprep.subr.bf16.mxu1 %v2380_v61 }
 0x2b0   :  { %2183 = vmatpush3.bf16.msra.mxu0 %v2381_v62  ;;  %2205 = vmatpush3.bf16.msra.mxu1 %v2382_v63 }
 0x2b1   :  { %2184 = vmatprep.subr.bf16.mxu0 %v2383_v0  ;;  %2206 = vmatprep.subr.bf16.mxu1 %v2384_v1 }
 0x2b4   :  { %2185 = vmatpush3.bf16.msra.mxu0 %v2385_v2  ;;  %2207 = vmatpush3.bf16.msra.mxu1 %v2386_v3 }
 0x2b5   :  { %2214 = vmatprep.subr.bf16.mxu0 %v2387_v4  ;;  %2236 = vmatprep.subr.bf16.mxu1 %v2388_v5 }
 0x362   :  { %v1029_v20 = vpop.f32.mrb[8].mxu0  ;;  %v1072_v21 = vpop.f32.mrb[8].mxu1 }
 0x363   :  { %v1209_v24 = vadd.f32 %v1172_v13, %v1029_v20  ;;  %v1211_v25 = vadd.f32 %v1180_v14, %v1072_v21  ;;  %v1031_v26 = vpop.f32.mrb[9].mxu0  ;;  %v1074_v27 = vpop.f32.mrb[9].mxu1  ;;  %v2390_v21 = vld [vmem:[#allocation14 + $0x180] sm:$0xff]  }
 0x364   :  { %v1210_v28 = vadd.f32 %v1176_v15, %v1031_v26  ;;  %v1212_v29 = vadd.f32 %v1184_v16, %v1074_v27  ;;  %v1033_v30 = vpop.f32.mrb[10].mxu0  ;;  %v1076_v32 = vpop.f32.mrb[10].mxu1 }
 0x365   :  { %vm1225_vm15 = vcmp.gt.f32.partialorder %v1209_v24, 0.0  ;;  %v1241_v35 = vmul.f32 0.1, %v1209_v24  ;;  %vm1227_vm0 = vcmp.gt.f32.partialorder %v1211_v25, 0.0  ;;  %v1243_v36 = vmul.f32 0.1, %v1211_v25 }
 0x366   :  { %vm1226_vm1 = vcmp.gt.f32.partialorder %v1210_v28, 0.0  ;;  %v1242_v37 = vmul.f32 0.1, %v1210_v28  ;;  %vm1228_vm2 = vcmp.gt.f32.partialorder %v1212_v29, 0.0  ;;  %v1244_v40 = vmul.f32 0.1, %v1212_v29 }
 0x367   :  { %v1217_v41 = vadd.f32 %v1172_v13, %v1033_v30  ;;  %v1219_v42 = vadd.f32 %v1180_v14, %v1076_v32  ;;  %v1035_v43 = vpop.f32.mrb[11].mxu0  ;;  %v1078_v44 = vpop.f32.mrb[11].mxu1  ;;  %v2998_v45 = vsel %vm1225_vm15, %v1209_v24, %v1241_v35  ;;  %v3000_v19 = vsel %vm1227_vm0, %v1211_v25, %v1243_v36  ;;  %v2394_v35 = vld [vmem:[#allocation14 + $0x188] sm:$0xff]  }
 0x368   :  { %v1218_v46 = vadd.f32 %v1176_v15, %v1035_v43  ;;  %v1220_v47 = vadd.f32 %v1184_v16, %v1078_v44  ;;  %v1258_v55 = vsel %vm1226_vm1, %v1210_v28, %v1242_v37  ;;  %v1260_v56 = vsel %vm1228_vm2, %v1212_v29, %v1244_v40  ;;  %v2389_v15 = vld [vmem:[#allocation14 + $0x100] sm:$0xff]   ;;  %v2395_v37 = vld [vmem:[#allocation14 + $0x150] sm:$0xff]  }
 0x369   :  { %vm1233_vm3 = vcmp.gt.f32.partialorder %v1217_v41, 0.0  ;;  %v1249_v48 = vmul.f32 0.1, %v1217_v41  ;;  %vm1235_vm4 = vcmp.gt.f32.partialorder %v1219_v42, 0.0  ;;  %v1251_v49 = vmul.f32 0.1, %v1219_v42 }
 0x36a   :  { %vm1234_vm5 = vcmp.gt.f32.partialorder %v1218_v46, 0.0  ;;  %v1250_v50 = vmul.f32 0.1, %v1218_v46  ;;  %vm1236_vm6 = vcmp.gt.f32.partialorder %v1220_v47, 0.0  ;;  %v1252_v51 = vmul.f32 0.1, %v1220_v47 }
 0x36b   :  { %v1265_v31 = vsel %vm1233_vm3, %v1217_v41, %v1249_v48  ;;  %v1267_v52 = vsel %vm1235_vm4, %v1219_v42, %v1251_v49  ;;  %v1115_v53 = vpop.f32.mrb[12].mxu0  ;;  %v1158_v54 = vpop.f32.mrb[12].mxu1  ;;  %v2397_v43 = vld [vmem:[#allocation14 + $0x110] sm:$0xff]   ;;  %v2403_v48 = vld [vmem:[#allocation14 + $0x160] sm:$0xff]  }
 0x36c   :  { %v1273_v57 = vpack.c.bf16 %v1265_v31, %v2998_v45  ;;  %v1275_v58 = vpack.c.bf16 %v1267_v52, %v3000_v19  ;;  %v1213_v59 = vadd.f32 %v1188_v33, %v1115_v53  ;;  %v1215_v60 = vadd.f32 %v1196_v34, %v1158_v54  ;;  %v1117_v61 = vpop.f32.mrb[13].mxu0  ;;  %v1160_v62 = vpop.f32.mrb[13].mxu1  ;;  %v2398_v44 = vld [vmem:[#allocation14 + $0x190] sm:$0xff]   ;;  %v2399_v45 = vld [vmem:[#allocation14 + $0x158] sm:$0xff]   ;;  %v2404_v49 = vld [vmem:[#allocation14 + $0x1e0] sm:$0xff]  }
 0x36d   :  { %v1214_v63 = vadd.f32 %v1192_v38, %v1117_v61  ;;  %v1216_v0 = vadd.f32 %v1200_v39, %v1160_v62  ;;  %v1119_v1 = vpop.f32.mrb[14].mxu0  ;;  %v1162_v2 = vpop.f32.mrb[14].mxu1  ;;  %v1266_v3 = vsel %vm1234_vm5, %v1218_v46, %v1250_v50  ;;  %v1268_v4 = vsel %vm1236_vm6, %v1220_v47, %v1252_v51  ;;  %v2400_v19 = vld [vmem:[#allocation14 + $0x1d8] sm:$0xff]   ;;  %v2405_v50 = vld [vmem:[#allocation14 + $0x120] sm:$0xff]   ;;  %v2407_v31 = vld [vmem:[#allocation14 + $0x168] sm:$0xff]  }
 0x36e   :  { %vm1229_vm7 = vcmp.gt.f32.partialorder %v1213_v59, 0.0  ;;  %v1245_v5 = vmul.f32 0.1, %v1213_v59  ;;  %vm1231_vm8 = vcmp.gt.f32.partialorder %v1215_v60, 0.0  ;;  %v1247_v6 = vmul.f32 0.1, %v1215_v60 }
 0x36f   :  { %vm1230_vm9 = vcmp.gt.f32.partialorder %v1214_v63, 0.0  ;;  %v1246_v7 = vmul.f32 0.1, %v1214_v63  ;;  %vm1232_vm10 = vcmp.gt.f32.partialorder %v1216_v0, 0.0  ;;  %v1248_v8 = vmul.f32 0.1, %v1216_v0 }
 0x370   :  { %v3008_v9 = vsel %vm1229_vm7, %v1213_v59, %v1245_v5  ;;  %v3010_v10 = vsel %vm1231_vm8, %v1215_v60, %v1247_v6  ;;  %v1221_v11 = vadd.f32 %v1188_v33, %v1119_v1  ;;  %v1223_v12 = vadd.f32 %v1196_v34, %v1162_v2  ;;  %v1121_v13 = vpop.f32.mrb[15].mxu0  ;;  %v1164_v14 = vpop.f32.mrb[15].mxu1  ;;  %v2393_v34 = vld [vmem:[#allocation14 + $0x108] sm:$0xff]   ;;  %v2401_v46 = vld [vmem:[#allocation14 + $0x118] sm:$0xff]   ;;  %v2406_v51 = vld [vmem:[#allocation14 + $0x1a0] sm:$0xff]  }
 0x371   :  { %v1222_v16 = vadd.f32 %v1192_v38, %v1121_v13  ;;  %v1224_v17 = vadd.f32 %v1200_v39, %v1164_v14  ;;  %v1274_v18 = vpack.c.bf16 %v1266_v3, %v1258_v55  ;;  %v1276_v20 = vpack.c.bf16 %v1268_v4, %v1260_v56  ;;  %v2396_v39 = vld [vmem:[#allocation14 + $0x1d0] sm:$0xff]   ;;  %v2402_v47 = vld [vmem:[#allocation14 + $0x198] sm:$0xff]   ;;  %v2408_v52 = vld [vmem:[#allocation14 + $0x1e8] sm:$0xff]  }
 0x372   :  { %vm1237_vm11 = vcmp.gt.f32.partialorder %v1221_v11, 0.0  ;;  %v1253_v24 = vmul.f32 0.1, %v1221_v11  ;;  %vm1239_vm12 = vcmp.gt.f32.partialorder %v1223_v12, 0.0  ;;  %v1255_v25 = vmul.f32 0.1, %v1223_v12 }
 0x373   :  { %vm1238_vm13 = vcmp.gt.f32.partialorder %v1222_v16, 0.0  ;;  %v1254_v26 = vmul.f32 0.1, %v1222_v16  ;;  %vm1240_vm14 = vcmp.gt.f32.partialorder %v1224_v17, 0.0  ;;  %v1256_v27 = vmul.f32 0.1, %v1224_v17  ;;  %1832 = vmatprep.mubr.bf16.mxu0 %v1274_v18  ;;  %1873 = vmatprep.mubr.bf16.mxu1 %v1276_v20 }
 0x374   :  { %v3012_v28 = vsel %vm1237_vm11, %v1221_v11, %v1253_v24  ;;  %v3014_v29 = vsel %vm1239_vm12, %v1223_v12, %v1255_v25  ;;  %1833 = vmatmul.mubr.bf16.vlgmr.msra.gmra.mrb[16].mxu0 %v1273_v57  ;;  %1874 = vmatmul.mubr.bf16.vlgmr.msra.gmra.mrb[16].mxu1 %v1275_v58  ;;  %v1262_v30 = vsel %vm1230_vm9, %v1214_v63, %v1246_v7  ;;  %v2409_v53 = vld [vmem:[#allocation14 + $0x128] sm:$0xff]   ;;  %v2411_v55 = vld [vmem:[#allocation14 + $0x170] sm:$0xff]   ;;  %v2415_v59 = vld [vmem:[#allocation14 + $0x178] sm:$0xff]  }
 0x375   :  { %v1277_v32 = vpack.c.bf16 %v3012_v28, %v3008_v9  ;;  %v1279_v33 = vpack.c.bf16 %v3014_v29, %v3010_v10  ;;  %2215 = vmatpush3.bf16.msra.mxu0 %v2389_v15  ;;  %2237 = vmatpush3.bf16.msra.mxu1 %v2390_v21  ;;  %v1270_v36 = vsel %vm1238_vm13, %v1222_v16, %v1254_v26  ;;  %v2410_v54 = vld [vmem:[#allocation14 + $0x1a8] sm:$0xff]   ;;  %v2412_v56 = vld [vmem:[#allocation14 + $0x1f0] sm:$0xff]   ;;  %v2416_v60 = vld [vmem:[#allocation14 + $0x1f8] sm:$0xff]  }
 0x376   :  { %2216 = vmatprep.subr.bf16.mxu0 %v2391_v22  ;;  %2238 = vmatprep.subr.bf16.mxu1 %v2392_v23  ;;  %v1278_v38 = vpack.c.bf16 %v1270_v36, %v1262_v30  ;;  %v1264_v40 = vsel %vm1232_vm10, %v1216_v0, %v1248_v8  ;;  %v1272_v41 = vsel %vm1240_vm14, %v1224_v17, %v1256_v27  ;;  %v2413_v57 = vld [vmem:[#allocation14 + $0x130] sm:$0xff]   ;;  %v2417_v61 = vld [vmem:[#allocation14 + $0x138] sm:$0xff]   ;;  %v2086_v1 = vld [vmem:[%s3059_s14] ss:$0 sm:$0xff]  ;;  %s2652_s14 = smov [#allocation16]  }
 0x377   :  { %v1280_v42 = vpack.c.bf16 %v1272_v41, %v1264_v40  ;;  %v2414_v58 = vld [vmem:[#allocation14 + $0x1b0] sm:$0xff]   ;;  %v2418_v62 = vld [vmem:[#allocation14 + $0x1b8] sm:$0xff]   ;;  %s1989_s9 = sshll.u32 %s2652_s14, 4  ;;  %s1990_s9 = int_to_ptr.vmem [resolvable:$true] %s1989_s9 }
 0x378   :  { %1914 = vmatprep.mubr.bf16.mxu0 %v1278_v38  ;;  %s2603_s18 = scalar_lea.vmem %s1990_s9, 256  ;;  %p2608_p9 = scmp.lt.s32.totalorder %s1990_s9, %s1990_s9 }
 0x379   :  { %2217 = vmatpush3.bf16.msra.mxu0 %v2393_v34  ;;  %2239 = vmatpush3.bf16.msra.mxu1 %v2394_v35  ;;  %p2604_p8 = scmp.ne.s32.totalorder %s1990_s9, %s2603_s18  ;;  %p2609_p10 = scmp.lt.s32.totalorder %s2603_s18, %s2603_s18 }
 0x37a   :  { %2218 = vmatprep.subr.bf16.mxu0 %v2395_v37  ;;  %2240 = vmatprep.subr.bf16.mxu1 %v2396_v39 }
 0x37b   :  { %1955 = vmatprep.mubr.bf16.mxu1 %v1280_v42  ;;  %p2610_p11 = por %p2609_p10, %p2608_p9 }
 0x37d   :  { %2219 = vmatpush3.bf16.msra.mxu0 %v2397_v43  ;;  %2241 = vmatpush3.bf16.msra.mxu1 %v2398_v44  ;;  %p2611_p12 = pnand %p2610_p11, %p2604_p8 }
 0x37e   :  { %2220 = vmatprep.subr.bf16.mxu0 %v2399_v45  ;;  %2242 = vmatprep.subr.bf16.mxu1 %v2400_v19 }
 0x381   :  { %2221 = vmatpush3.bf16.msra.mxu0 %v2401_v46  ;;  %2243 = vmatpush3.bf16.msra.mxu1 %v2402_v47 }
 0x382   :  { %2222 = vmatprep.subr.bf16.mxu0 %v2403_v48  ;;  %2244 = vmatprep.subr.bf16.mxu1 %v2404_v49 }
 0x385   :  { %2223 = vmatpush3.bf16.msra.mxu0 %v2405_v50  ;;  %2245 = vmatpush3.bf16.msra.mxu1 %v2406_v51 }
 0x386   :  { %2224 = vmatprep.subr.bf16.mxu0 %v2407_v31  ;;  %2246 = vmatprep.subr.bf16.mxu1 %v2408_v52 }
 0x389   :  { %2225 = vmatpush3.bf16.msra.mxu0 %v2409_v53  ;;  %2247 = vmatpush3.bf16.msra.mxu1 %v2410_v54 }
 0x38a   :  { %2226 = vmatprep.subr.bf16.mxu0 %v2411_v55  ;;  %2248 = vmatprep.subr.bf16.mxu1 %v2412_v56 }
 0x38d   :  { %2227 = vmatpush3.bf16.msra.mxu0 %v2413_v57  ;;  %2249 = vmatpush3.bf16.msra.mxu1 %v2414_v58 }
 0x38e   :  { %2228 = vmatprep.subr.bf16.mxu0 %v2415_v59  ;;  %2250 = vmatprep.subr.bf16.mxu1 %v2416_v60 }
 0x391   :  { %2229 = vmatpush3.bf16.msra.mxu0 %v2417_v61  ;;  %2251 = vmatpush3.bf16.msra.mxu1 %v2418_v62 }
 0x394   :  { %1915 = vmatmul.mubr.bf16.vlgmr.msra.gmra.mrb[20].mxu0 %v1277_v32  ;;  %1956 = vmatmul.mubr.bf16.vlgmr.msra.gmra.mrb[20].mxu1 %v1279_v33 }
 0x447   :  { %v2186_v63 = vpop.f32.mrb[16].mxu0  ;;  %v2208_v0 = vpop.f32.mrb[16].mxu1 }
 0x448   :  { %v2187_v2 = vpop.f32.mrb[17].mxu0  ;;  %v2209_v3 = vpop.f32.mrb[17].mxu1 }
 0x449   :  { %v2188_v4 = vadd.f32 %v2187_v2, %v2186_v63  ;;  %v2210_v5 = vadd.f32 %v2209_v3, %v2208_v0  ;;  %v2189_v6 = vpop.f32.mrb[18].mxu0  ;;  %v2211_v7 = vpop.f32.mrb[18].mxu1 }
 0x44a   :  { %v2190_v8 = vpop.f32.mrb[19].mxu0  ;;  %v2212_v11 = vpop.f32.mrb[19].mxu1 }
 0x44b   :  { %v1835_v9 = vadd.f32 %v2188_v4, %v2086_v1  ;;  %v2191_v12 = vadd.f32 %v2190_v8, %v2189_v6  ;;  %v2213_v13 = vadd.f32 %v2212_v11, %v2211_v7 }
 0x44d   :  { %v1876_v14 = vadd.f32 %v2210_v5, %v1835_v9  ;;  %v1838_v10 = vadd.f32 %v2191_v12, %v2086_v1 }
 0x44f   :  { %v1879_v15 = vadd.f32 %v2213_v13, %v1838_v10 }
 0x467   :  { %v2230_v16 = vpop.f32.mrb[20].mxu0  ;;  %v2252_v17 = vpop.f32.mrb[20].mxu1 }
 0x468   :  { %v2231_v18 = vpop.f32.mrb[21].mxu0  ;;  %v2253_v20 = vpop.f32.mrb[21].mxu1 }
 0x469   :  { %v2232_v21 = vadd.f32 %v2231_v18, %v2230_v16  ;;  %v2254_v22 = vadd.f32 %v2253_v20, %v2252_v17  ;;  %v2233_v23 = vpop.f32.mrb[22].mxu0  ;;  %v2255_v24 = vpop.f32.mrb[22].mxu1 }
 0x46a   :  { %v2234_v25 = vpop.f32.mrb[23].mxu0  ;;  %v2256_v26 = vpop.f32.mrb[23].mxu1 }
 0x46b   :  { %v1917_v27 = vadd.f32 %v2232_v21, %v1876_v14  ;;  %v2235_v28 = vadd.f32 %v2234_v25, %v2233_v23  ;;  %v2257_v29 = vadd.f32 %v2256_v26, %v2255_v24 }
 0x46d   :  { %v1920_v30 = vadd.f32 %v2235_v28, %v1879_v15  ;;  %v1958_v32 = vadd.f32 %v2254_v22, %v1917_v27 }
 0x46f   :  { %1964 = vmax.xlane.f32.xlu0 %v1958_v32  ;;  %v1961_v33 = vadd.f32 %v2257_v29, %v1920_v30 }
 0x473   :  { %1966 = vmax.xlane.f32.xlu0 %v1961_v33 }
 0x4fc   :  { %v1965_v34 = vpop.xlane.xlu0 %1964 }
 0x4fd   :  { %v1968_v35 = vsub.f32 %v1958_v32, %v1965_v34 }
 0x4ff   :  { %v1970_v36 = vmul.f32 1.442695, %v1968_v35 }
 0x500   :  { %v1967_v37 = vpop.xlane.xlu0 %1966 }
 0x501   :  { %2419 = vpow2.f32 %v1970_v36  ;;  %v1969_v38 = vsub.f32 %v1961_v33, %v1967_v37 }
 0x503   :  { %v1972_v39 = vmul.f32 1.442695, %v1969_v38 }
 0x505   :  { %2421 = vpow2.f32 %v1972_v39 }
 0x50b   :  { %v2420_v40 = vpop.eup %2419 }
 0x50c   :  { %1974 = vadd.xlane.f32.xlu1 %v2420_v40 }
 0x50f   :  { %v2422_v41 = vpop.eup %2421 }
 0x510   :  { %1976 = vadd.xlane.f32.xlu1 %v2422_v41 }
 0x599   :  { %v1975_v42 = vpop.xlane.xlu1 %1974 }
 0x59a   :  { %2423 = vrcp.f32 %v1975_v42 }
 0x59d   :  { %v1977_v43 = vpop.xlane.xlu1 %1976 }
 0x59e   :  { %2425 = vrcp.f32 %v1977_v43 }
 0x5a4   :  { %v2424_v44 = vpop.eup %2423 }
 0x5a5   :  { %v1979_v45 = vmul.f32 %v2424_v44, %v2420_v40 }
 0x5a7   :  { %1982 = vst [vmem:[#allocation16] sm:$0xff] %v1979_v45 }
 0x5a8   :  { %v2426_v19 = vpop.eup %2425 }
 0x5a9   :  { %v1981_v46 = vmul.f32 %v2426_v19, %v2422_v41 }
 0x5ab   :  { %1983 = vst [vmem:[#allocation16 + $0x8] sm:$0xff] %v1981_v46 }
 0x5ac   :  { %2614 = shalt.err (!%p2611_p12)
}
 0x5ad   :  { %s2615_s19 = scalar_lea.hbm %s3060_s15, 256 }
 0x5ae   :  { %p2616_p13 = scmp.ne.s32.totalorder %s3060_s15, %s2615_s19  ;;  %p2619_p0 = scmp.lt.u32.totalorder %s2615_s19, %s3060_s15 }
 0x5b0   :  { %p2621_p1 = pnand %p2619_p0, %p2616_p13 }
 0x5b2   :  { %2624 = shalt.err (!%p2621_p1)
}
 0x5b3   :  { %s2653_s23 = smov 128   ;;  %s2654_s5 = smov 8  }
 0x5b4   :  { %1995 = dma.vmem_to_hbm [thread:$0]  %s1990_s9, 256, %s3060_s15, [#allocation4], %s2653_s23, %s2653_s23, %s2654_s5  }
 0x5b5   :  { %2635 = dma.done.wait [#allocation4], 256  }
 0x5b6   :  { %2636 = vsyncadd [#allocation4], 4294967040 }
 0x5b7   :  { %1999 = vsyncpa [#allocation3], 1 }
 0x5b8   :  { %2000 = vsyncpa [#allocation6], 1 }
 0x5b9   :  { %2001 = vsyncpa [#allocation9], 1 }
 0x5ba   :  { %2002 = vsyncpa [#allocation12], 1 }
 0x5bb   :  { %2003 = vsyncpa [#allocation15], 1 }
 0x5bc   :  { %2004 = vsyncpa [#allocation4], 1 }

</bundles_post_ra>
